<compile_context>
chip_gen: v6e
topology: v6e:2x2x1
jax: 0.10.0
libtpu: 0.0.40
codegen_flags: <defaults>
</compile_context>

<pallas_src>
import functools
import math

import jax
import jax.numpy as jnp
from jax import lax
from jax.experimental import pallas as pl
from jax.experimental.pallas import tpu as pltpu


# --------------------------------------------------------------------------
# Helpers
# --------------------------------------------------------------------------
def _round_up(x, m):
    return ((x + m - 1) // m) * m


def _sublane(dtype):
    """Minimum sublane multiple for a dtype (8 f32 / 16 bf16 / 32 int8|fp8)."""
    return max(8, 32 // max(jnp.dtype(dtype).itemsize, 1))


def _tile(n, t_max, dtype):
    """Largest legal tile: full extent if it fits, else a sublane-aligned t_max."""
    t_max = _round_up(t_max, _sublane(dtype))
    return n if n <= t_max else t_max


@functools.lru_cache(maxsize=None)
def _vmem_limit_bytes():
    """Scoped-VMEM request with headroom (v5e/v6e -> ~96 MiB, v7x -> ~48 MiB)."""
    cap = 64 * 1024 * 1024  # conservative fallback = v7x physical per-TC VMEM
    try:
        info = pltpu.get_tpu_info()
        cap = int(getattr(info, "vmem_capacity_bytes", cap))
    except Exception:
        pass
    return min(cap * 3 // 4, 100 * 1024 * 1024)


_RESIDENT_SINGLE_BUFFER_MIN_BYTES = 1 << 20  # only bother for large weights


def _resident_spec(block_shape, index_map, nbytes):
    """BlockSpec whose block index never changes; single-buffer it when large."""
    if nbytes >= _RESIDENT_SINGLE_BUFFER_MIN_BYTES:
        try:
            return pl.BlockSpec(block_shape, index_map,
                                pipeline_mode=pl.Buffered(1))
        except Exception:
            pass
    return pl.BlockSpec(block_shape, index_map)


# --------------------------------------------------------------------------
# Linear projection kernels (row-tiled, weights resident in VMEM)
# --------------------------------------------------------------------------
def _linear_kernel(x_ref, w_ref, o_ref):
    o_ref[...] = jnp.dot(x_ref[...], w_ref[...],
                         preferred_element_type=jnp.float32).astype(o_ref.dtype)


def _linear_bias_kernel(x_ref, w_ref, b_ref, o_ref):
    acc = jnp.dot(x_ref[...], w_ref[...], preferred_element_type=jnp.float32)
    o_ref[...] = (acc + b_ref[...].astype(jnp.float32)).astype(o_ref.dtype)


def _linear(x2d, w, b=None, *, tile_m=512):
    """y = x2d @ w (+ b).  x2d: (M, D), w: (D, N), b: (N,) or None."""
    M, D = x2d.shape
    N = w.shape[1]
    tm = _tile(M, tile_m, x2d.dtype)
    grid = (pl.cdiv(M, tm),)                    # ragged last block handled by Pallas
    itemsize = jnp.dtype(x2d.dtype).itemsize

    cost = pl.CostEstimate(
        flops=2 * M * D * N,
        transcendentals=0,
        bytes_accessed=(M * D + D * N + M * N) * itemsize,
    )
    cparams = pltpu.CompilerParams(
        dimension_semantics=("parallel",),
        vmem_limit_bytes=_vmem_limit_bytes(),
    )

    x_spec = pl.BlockSpec((tm, D), lambda i: (i, 0))
    w_spec = _resident_spec((D, N), lambda i: (0, 0), D * N * itemsize)
    o_spec = pl.BlockSpec((tm, N), lambda i: (i, 0))
    out_shape = jax.ShapeDtypeStruct((M, N), x2d.dtype)

    if b is None:
        return pl.pallas_call(
            _linear_kernel,
            out_shape=out_shape,
            grid_spec=pltpu.PrefetchScalarGridSpec(
                num_scalar_prefetch=0, grid=grid,
                in_specs=[x_spec, w_spec], out_specs=o_spec),
            compiler_params=cparams,
            cost_estimate=cost,
        )(x2d, w)

    b2 = b.reshape(1, N)
    b_spec = _resident_spec((1, N), lambda i: (0, 0), N * itemsize)
    return pl.pallas_call(
        _linear_bias_kernel,
        out_shape=out_shape,
        grid_spec=pltpu.PrefetchScalarGridSpec(
            num_scalar_prefetch=0, grid=grid,
            in_specs=[x_spec, w_spec, b_spec], out_specs=o_spec),
        compiler_params=cparams,
        cost_estimate=cost,
    )(x2d, w, b2)


# --------------------------------------------------------------------------
# Flash attention on packed-head layout (online softmax over KV tiles)
# --------------------------------------------------------------------------
def _flash_attn_kernel(q_ref, k_ref, v_ref, o_ref, m_sc, l_sc, acc_sc, *,
                       scale, heads, dim_head, kv_len, tk, exp_bf16):
    kv = pl.program_id(2)

    @pl.when(kv == 0)
    def _init():
        m_sc[...] = jnp.full(m_sc.shape, -jnp.inf, dtype=jnp.float32)
        l_sc[...] = jnp.zeros(l_sc.shape, dtype=jnp.float32)
        acc_sc[...] = jnp.zeros(acc_sc.shape, dtype=jnp.float32)

    # Softmax scale folded into q (tq*inner mults << heads*tq*tk mults on s).
    q = q_ref[...] * scale               # (tq, inner), native dtype
    k = k_ref[...]                        # (tk, inner)
    v = v_ref[...]                        # (tk, inner)

    # Additive padding bias over columns, built once per step on (1, tk) only.
    # K/V are explicitly zero-padded, so s is finite and the bias add is NaN-safe.
    if kv_len is not None:
        col = kv * tk + lax.broadcasted_iota(jnp.int32, (1, tk), 1)
        pad_bias = jnp.where(col < kv_len, 0.0, -1e30).astype(jnp.float32)
    else:
        pad_bias = None

    for h in range(heads):                # static unroll; heads is small
        sl = slice(h * dim_head, (h + 1) * dim_head)
        # scores in f32 on the MXU; operands stay in their native dtype
        s = lax.dot_general(q[:, sl], k[:, sl],
                            dimension_numbers=(((1,), (1,)), ((), ())),
                            preferred_element_type=jnp.float32)   # (tq, tk)
        if pad_bias is not None:
            s = s + pad_bias

        m_prev = m_sc[:, h:h + 1]                                  # (tq, 1)
        m_new = jnp.maximum(m_prev, s.max(axis=-1, keepdims=True))
        alpha = jnp.exp(m_prev - m_new)
        if exp_bf16:
            # bf16 EUP exp (v6e/v7x): halves exp width on the binding unit.
            p = jnp.exp((s - m_new).astype(jnp.bfloat16))
            p_sum = p.astype(jnp.float32).sum(axis=-1, keepdims=True)
        else:
            p = jnp.exp(s - m_new)
            p_sum = p.sum(axis=-1, keepdims=True)
        l_sc[:, h:h + 1] = alpha * l_sc[:, h:h + 1] + p_sum
        acc_sc[:, sl] = alpha * acc_sc[:, sl] + jnp.dot(
            p.astype(v.dtype), v[:, sl], preferred_element_type=jnp.float32)
        m_sc[:, h:h + 1] = m_new

    @pl.when(kv == pl.num_programs(2) - 1)
    def _finalize():
        inv = pl.reciprocal(l_sc[...], approx=True)          # (tq, heads) on EUP
        for h in range(heads):
            sl = slice(h * dim_head, (h + 1) * dim_head)
            acc_sc[:, sl] = acc_sc[:, sl] * inv[:, h:h + 1]
        # single lane-dense store of the merged (tq, heads*dim_head) slab
        o_ref[...] = acc_sc[...].astype(o_ref.dtype)


def _mea_attention(q_arr, k_arr, v_arr, *, q_blk, k_blk, v_blk,
                   heads, dim_head, scale, tq_max=512, tk_max=512):
    """Attention on packed-head activations.

    q_arr: (B, Nq, *), k_arr/v_arr: (B, Nk, *); the q/k/v columns are the
    `inner`-wide block `q_blk`/`k_blk`/`v_blk` of the last dimension.
    Returns (B, Nq, heads*dim_head).
    """
    B, Nq, _ = q_arr.shape
    _, Nk, _ = k_arr.shape
    inner = heads * dim_head
    dtype = q_arr.dtype

    for arr in (q_arr, k_arr, v_arr):   # last-dim block legality
        assert inner % 128 == 0 or arr.shape[-1] == inner

    tq = _tile(Nq, tq_max, dtype)
    tk = _tile(Nk, tk_max, dtype)

    # Pad K/V rows so no uninitialised data reaches max()/exp(); Q stays ragged
    # (garbage Q rows only produce garbage output rows that are never stored).
    Nk_p = _round_up(Nk, tk)
    if Nk_p != Nk:
        pad = ((0, 0), (0, Nk_p - Nk), (0, 0))
        k_pad = jnp.pad(k_arr, pad)
        v_pad = k_pad if (v_arr is k_arr) else jnp.pad(v_arr, pad)
        if q_arr is k_arr:
            q_arr = k_pad
        k_arr, v_arr = k_pad, v_pad
    kv_len = Nk if Nk_p != Nk else None

    kernel = functools.partial(
        _flash_attn_kernel, scale=scale, heads=heads, dim_head=dim_head,
        kv_len=kv_len, tk=tk, exp_bf16=(dtype == jnp.bfloat16))

    itemsize = jnp.dtype(dtype).itemsize
    nq_tiles = pl.cdiv(Nq, tq)
    cost = pl.CostEstimate(
        flops=4 * B * heads * Nq * Nk_p * dim_head,
        transcendentals=B * heads * Nq * Nk_p,
        # K/V are re-streamed from HBM once per q tile.
        bytes_accessed=(2 * B * Nq * inner
                        + 2 * B * nq_tiles * Nk_p * inner) * itemsize,
    )

    grid = (B, nq_tiles, Nk_p // tk)    # reduction (kv) axis last

    out = pl.pallas_call(
        kernel,
        out_shape=jax.ShapeDtypeStruct((B, Nq, inner), dtype),
        grid_spec=pltpu.PrefetchScalarGridSpec(
            num_scalar_prefetch=0,
            grid=grid,
            in_specs=[
                pl.BlockSpec((None, tq, inner), lambda b, qi, ki: (b, qi, q_blk)),
                pl.BlockSpec((None, tk, inner), lambda b, qi, ki: (b, ki, k_blk)),
                pl.BlockSpec((None, tk, inner), lambda b, qi, ki: (b, ki, v_blk)),
            ],
            out_specs=pl.BlockSpec((None, tq, inner),
                                   lambda b, qi, ki: (b, qi, 0)),
            scratch_shapes=[
                pltpu.VMEM((tq, heads), jnp.float32),   # running max per head
                pltpu.VMEM((tq, heads), jnp.float32),   # running denom per head
                pltpu.VMEM((tq, inner), jnp.float32),   # output accumulator
            ],
        ),
        compiler_params=pltpu.CompilerParams(
            dimension_semantics=("parallel", "parallel", "arbitrary"),
            vmem_limit_bytes=_vmem_limit_bytes(),
        ),
        cost_estimate=cost,
    )(q_arr, k_arr, v_arr)
    return out


# --------------------------------------------------------------------------
# Module forward
# --------------------------------------------------------------------------
@functools.partial(
    jax.jit,
    static_argnames=("heads", "dim_head", "attn_tile_q", "attn_tile_kv"))
def memory_efficient_cross_attention(x, Wq, Wk, Wv, Wo, bo, *, heads, dim_head,
                                     context=None,
                                     attn_tile_q=512, attn_tile_kv=512):
    """x: (B, Nq, query_dim); context: (B, Nk, context_dim) or None (= x)."""
    B, Nq, Dq = x.shape
    inner = heads * dim_head
    lane_ok = (inner % 128 == 0)   # can select q/k/v columns via BlockSpec index

    if context is None:
        # Self-attention: one fused (Dq, 3*inner) projection over x.
        w_qkv = jnp.concatenate([Wq, Wk, Wv], axis=1)
        qkv = _linear(x.reshape(B * Nq, Dq), w_qkv).reshape(B, Nq, 3 * inner)
        if lane_ok:
            q_arr = k_arr = v_arr = qkv
            blks = (0, 1, 2)
        else:   # tiny heads (lane constraint): fall back to host slices
            q_arr = qkv[..., :inner]
            k_arr = qkv[..., inner:2 * inner]
            v_arr = qkv[..., 2 * inner:]
            blks = (0, 0, 0)
    else:
        _, Nk, Dc = context.shape
        q_arr = _linear(x.reshape(B * Nq, Dq), Wq).reshape(B, Nq, inner)
        w_kv = jnp.concatenate([Wk, Wv], axis=1)
        kv = _linear(context.reshape(B * Nk, Dc), w_kv).reshape(B, Nk, 2 * inner)
        if lane_ok:
            k_arr = v_arr = kv
            blks = (0, 0, 1)
        else:
            k_arr = kv[..., :inner]
            v_arr = kv[..., inner:]
            blks = (0, 0, 0)

    o = _mea_attention(q_arr, k_arr, v_arr,
                       q_blk=blks[0], k_blk=blks[1], v_blk=blks[2],
                       heads=heads, dim_head=dim_head,
                       scale=1.0 / math.sqrt(dim_head),
                       tq_max=attn_tile_q, tk_max=attn_tile_kv)   # (B, Nq, inner)

    out = _linear(o.reshape(B * Nq, inner), Wo, bo)   # Dropout(p=0.0) is identity
    return out.reshape(B, Nq, Wo.shape[1])


# --------------------------------------------------------------------------
# Pure-JAX reference
# --------------------------------------------------------------------------
def _reference(x, Wq, Wk, Wv, Wo, bo, *, heads, dim_head, context=None):
    ctx = x if context is None else context
    B, Nq, _ = x.shape
    q = jnp.einsum("bnd,de->bne", x, Wq)
    k = jnp.einsum("bnd,de->bne", ctx, Wk)
    v = jnp.einsum("bnd,de->bne", ctx, Wv)

    def to_heads(t):
        Bn, N, _ = t.shape
        return t.reshape(Bn, N, heads, dim_head).transpose(0, 2, 1, 3)

    qh, kh, vh = to_heads(q), to_heads(k), to_heads(v)
    qh = qh * (1.0 / math.sqrt(dim_head))   # scale folded into q (as in kernel)
    s = jnp.einsum("bhqd,bhkd->bhqk", qh, kh)
    p = jax.nn.softmax(s, axis=-1)
    oh = jnp.einsum("bhqk,bhkd->bhqd", p, vh)
    o = oh.transpose(0, 2, 1, 3).reshape(B, Nq, heads * dim_head)
    return jnp.einsum("bnd,do->bno", o, Wo) + bo


# --------------------------------------------------------------------------
# Demo / self-check
# --------------------------------------------------------------------------
if __name__ == "__main__":
    # Small config: batch=2, query seq=16, context seq=8,
    # query_dim=32, context_dim=48, heads=4, dim_head=16 -> inner_dim=64
    B, Nq, Nk = 2, 16, 8
    query_dim, context_dim = 32, 48
    heads, dim_head = 4, 16
    inner = heads * dim_head

    key = jax.random.PRNGKey(0)
    kx, kc, k1, k2, k3, k4, k5 = jax.random.split(key, 7)

    x = jax.random.normal(kx, (B, Nq, query_dim), dtype=jnp.float32)
    ctx = jax.random.normal(kc, (B, Nk, context_dim), dtype=jnp.float32)

    def uni(k, shape, fan_in):
        bound = 1.0 / math.sqrt(fan_in)
        return jax.random.uniform(k, shape, minval=-bound, maxval=bound,
                                  dtype=jnp.float32)

    Wq = uni(k1, (query_dim, inner), query_dim)
    Wk = uni(k2, (context_dim, inner), context_dim)
    Wv = uni(k3, (context_dim, inner), context_dim)
    Wo = uni(k4, (inner, query_dim), inner)
    bo = uni(k5, (query_dim,), inner)

    TOL = dict(atol=5e-3, rtol=5e-3)

    # 1) Cross-attention path (context provided).
    out_x = memory_efficient_cross_attention(
        x, Wq, Wk, Wv, Wo, bo, heads=heads, dim_head=dim_head, context=ctx)
    out_x = jax.block_until_ready(out_x)
    ref_x = _reference(x, Wq, Wk, Wv, Wo, bo, heads=heads, dim_head=dim_head,
                       context=ctx)
    assert out_x.shape == (B, Nq, query_dim)
    assert jnp.allclose(out_x, ref_x, **TOL), "cross-attn mismatch vs reference"

    # 2) Self-attention path (context=None -> context := x), fused QKV projection.
    Wk_s = uni(k2, (query_dim, inner), query_dim)
    Wv_s = uni(k3, (query_dim, inner), query_dim)
    out_s = memory_efficient_cross_attention(
        x, Wq, Wk_s, Wv_s, Wo, bo, heads=heads, dim_head=dim_head)
    out_s = jax.block_until_ready(out_s)
    ref_s = _reference(x, Wq, Wk_s, Wv_s, Wo, bo, heads=heads, dim_head=dim_head)
    assert jnp.allclose(out_s, ref_s, **TOL), "self-attn mismatch vs reference"

    # 3) Ragged / tiled path: query & context lengths not multiples of the tiles
    #    (exercises KV zero-pad + column mask and ragged Q/output blocks).
    x3 = jax.random.normal(kx, (B, 12, query_dim), dtype=jnp.float32)
    ctx3 = jax.random.normal(kc, (B, 10, context_dim), dtype=jnp.float32)
    out_r = memory_efficient_cross_attention(
        x3, Wq, Wk, Wv, Wo, bo, heads=heads, dim_head=dim_head, context=ctx3,
        attn_tile_q=8, attn_tile_kv=8)
    out_r = jax.block_until_ready(out_r)
    ref_r = _reference(x3, Wq, Wk, Wv, Wo, bo, heads=heads, dim_head=dim_head,
                       context=ctx3)
    assert out_r.shape == (B, 12, query_dim)
    assert jnp.allclose(out_r, ref_r, **TOL), "ragged attn mismatch vs reference"

    print("KERNEL_OK")
</pallas_src>

<mosaic_0001>
module attributes {stable_mosaic.version = 11 : i64} {
  func.func @_linear_kernel(%arg0: i32, %arg1: memref<16x48xf32, #tpu.memory_space<vmem>>, %arg2: memref<48x128xf32, #tpu.memory_space<vmem>>, %arg3: memref<16x128xf32, #tpu.memory_space<vmem>>) attributes {dimension_semantics = [#tpu.dimension_semantics<parallel>], iteration_bounds = array<i64: 1>, scalar_prefetch = 0 : i64, scratch_operands = 0 : i64, tpu.core_type = #tpu.core_type<tc>, window_params = [{transform_indices = @transform_0, window_bounds = array<i64: 16, 48>}, {pipeline_mode = #tpu.pipeline_mode<synchronous>, transform_indices = @transform_1, window_bounds = array<i64: 48, 128>}, {transform_indices = @transform_2, window_bounds = array<i64: 16, 128>}]} {
    %c0 = arith.constant 0 : index
    %c0_0 = arith.constant 0 : index
    %0 = vector.load %arg1[%c0, %c0_0] : memref<16x48xf32, #tpu.memory_space<vmem>>, vector<16x48xf32>
    %c0_1 = arith.constant 0 : index
    %c0_2 = arith.constant 0 : index
    %1 = vector.load %arg2[%c0_1, %c0_2] : memref<48x128xf32, #tpu.memory_space<vmem>>, vector<48x128xf32>
    %cst = arith.constant dense<0.000000e+00> : vector<16x128xf32>
    %2 = tpu.matmul %0, %1, %cst {dimension_numbers = #tpu.dot_dimension_numbers<[1], [0], [0], [1], [0, 0, 1, 1], [], []>} : vector<16x48xf32>, vector<48x128xf32>, vector<16x128xf32> -> vector<16x128xf32>
    %c0_3 = arith.constant 0 : index
    %c0_4 = arith.constant 0 : index
    %3 = vector.load %arg3[%c0_3, %c0_4] : memref<16x128xf32, #tpu.memory_space<vmem>>, vector<16x128xf32>
    tpu.vector_store %arg3[%c0_3, %c0_4], %2 {strides = array<i32>} : memref<16x128xf32, #tpu.memory_space<vmem>>, vector<16x128xf32>,
    return
  }
  func.func @transform_0(%arg0: i32) -> (i32, i32) {
    %c0_i32 = arith.constant 0 : i32
    %c0_i32_0 = arith.constant 0 : i32
    return %arg0, %c0_i32 : i32, i32
  }
  func.func @transform_1(%arg0: i32) -> (i32, i32) {
    %c0_i32 = arith.constant 0 : i32
    %c0_i32_0 = arith.constant 0 : i32
    %c0_i32_1 = arith.constant 0 : i32
    return %c0_i32, %c0_i32_0 : i32, i32
  }
  func.func @transform_2(%arg0: i32) -> (i32, i32) {
    %c0_i32 = arith.constant 0 : i32
    %c0_i32_0 = arith.constant 0 : i32
    return %arg0, %c0_i32 : i32, i32
  }
}

module attributes {stable_mosaic.version = 11 : i64} {
  func.func @_linear_kernel(%arg0: i32, %arg1: memref<32x32xf32, #tpu.memory_space<vmem>>, %arg2: memref<32x64xf32, #tpu.memory_space<vmem>>, %arg3: memref<32x64xf32, #tpu.memory_space<vmem>>) attributes {dimension_semantics = [#tpu.dimension_semantics<parallel>], iteration_bounds = array<i64: 1>, scalar_prefetch = 0 : i64, scratch_operands = 0 : i64, tpu.core_type = #tpu.core_type<tc>, window_params = [{transform_indices = @transform_0, window_bounds = array<i64: 32, 32>}, {pipeline_mode = #tpu.pipeline_mode<synchronous>, transform_indices = @transform_1, window_bounds = array<i64: 32, 64>}, {transform_indices = @transform_2, window_bounds = array<i64: 32, 64>}]} {
    %c0 = arith.constant 0 : index
    %c0_0 = arith.constant 0 : index
    %0 = vector.load %arg1[%c0, %c0_0] : memref<32x32xf32, #tpu.memory_space<vmem>>, vector<32x32xf32>
    %c0_1 = arith.constant 0 : index
    %c0_2 = arith.constant 0 : index
    %1 = vector.load %arg2[%c0_1, %c0_2] : memref<32x64xf32, #tpu.memory_space<vmem>>, vector<32x64xf32>
    %cst = arith.constant dense<0.000000e+00> : vector<32x64xf32>
    %2 = tpu.matmul %0, %1, %cst {dimension_numbers = #tpu.dot_dimension_numbers<[1], [0], [0], [1], [0, 0, 1, 1], [], []>} : vector<32x32xf32>, vector<32x64xf32>, vector<32x64xf32> -> vector<32x64xf32>
    %c0_3 = arith.constant 0 : index
    %c0_4 = arith.constant 0 : index
    %3 = vector.load %arg3[%c0_3, %c0_4] : memref<32x64xf32, #tpu.memory_space<vmem>>, vector<32x64xf32>
    tpu.vector_store %arg3[%c0_3, %c0_4], %2 {strides = array<i32>} : memref<32x64xf32, #tpu.memory_space<vmem>>, vector<32x64xf32>,
    return
  }
  func.func @transform_0(%arg0: i32) -> (i32, i32) {
    %c0_i32 = arith.constant 0 : i32
    %c0_i32_0 = arith.constant 0 : i32
    return %arg0, %c0_i32 : i32, i32
  }
  func.func @transform_1(%arg0: i32) -> (i32, i32) {
    %c0_i32 = arith.constant 0 : i32
    %c0_i32_0 = arith.constant 0 : i32
    %c0_i32_1 = arith.constant 0 : i32
    return %c0_i32, %c0_i32_0 : i32, i32
  }
  func.func @transform_2(%arg0: i32) -> (i32, i32) {
    %c0_i32 = arith.constant 0 : i32
    %c0_i32_0 = arith.constant 0 : i32
    return %arg0, %c0_i32 : i32, i32
  }
}

module attributes {stable_mosaic.version = 11 : i64} {
  func.func @_linear_bias_kernel(%arg0: i32, %arg1: memref<32x64xf32, #tpu.memory_space<vmem>>, %arg2: memref<64x32xf32, #tpu.memory_space<vmem>>, %arg3: memref<1x32xf32, #tpu.memory_space<vmem>>, %arg4: memref<32x32xf32, #tpu.memory_space<vmem>>) attributes {dimension_semantics = [#tpu.dimension_semantics<parallel>], iteration_bounds = array<i64: 1>, scalar_prefetch = 0 : i64, scratch_operands = 0 : i64, tpu.core_type = #tpu.core_type<tc>, window_params = [{transform_indices = @transform_0, window_bounds = array<i64: 32, 64>}, {pipeline_mode = #tpu.pipeline_mode<synchronous>, transform_indices = @transform_1, window_bounds = array<i64: 64, 32>}, {pipeline_mode = #tpu.pipeline_mode<synchronous>, transform_indices = @transform_2, window_bounds = array<i64: 1, 32>}, {transform_indices = @transform_3, window_bounds = array<i64: 32, 32>}]} {
    %c0 = arith.constant 0 : index
    %c0_0 = arith.constant 0 : index
    %0 = vector.load %arg1[%c0, %c0_0] : memref<32x64xf32, #tpu.memory_space<vmem>>, vector<32x64xf32>
    %c0_1 = arith.constant 0 : index
    %c0_2 = arith.constant 0 : index
    %1 = vector.load %arg2[%c0_1, %c0_2] : memref<64x32xf32, #tpu.memory_space<vmem>>, vector<64x32xf32>
    %cst = arith.constant dense<0.000000e+00> : vector<32x32xf32>
    %2 = tpu.matmul %0, %1, %cst {dimension_numbers = #tpu.dot_dimension_numbers<[1], [0], [0], [1], [0, 0, 1, 1], [], []>} : vector<32x64xf32>, vector<64x32xf32>, vector<32x32xf32> -> vector<32x32xf32>
    %c0_3 = arith.constant 0 : index
    %c0_4 = arith.constant 0 : index
    %3 = vector.load %arg3[%c0_3, %c0_4] : memref<1x32xf32, #tpu.memory_space<vmem>>, vector<1x32xf32>
    %4 = vector.broadcast %3 : vector<1x32xf32> to vector<32x32xf32>
    %5 = arith.addf %2, %4 : vector<32x32xf32>
    %c0_5 = arith.constant 0 : index
    %c0_6 = arith.constant 0 : index
    %6 = vector.load %arg4[%c0_5, %c0_6] : memref<32x32xf32, #tpu.memory_space<vmem>>, vector<32x32xf32>
    tpu.vector_store %arg4[%c0_5, %c0_6], %5 {strides = array<i32>} : memref<32x32xf32, #tpu.memory_space<vmem>>, vector<32x32xf32>,
    return
  }
  func.func @transform_0(%arg0: i32) -> (i32, i32) {
    %c0_i32 = arith.constant 0 : i32
    %c0_i32_0 = arith.constant 0 : i32
    return %arg0, %c0_i32 : i32, i32
  }
  func.func @transform_1(%arg0: i32) -> (i32, i32) {
    %c0_i32 = arith.constant 0 : i32
    %c0_i32_0 = arith.constant 0 : i32
    %c0_i32_1 = arith.constant 0 : i32
    return %c0_i32, %c0_i32_0 : i32, i32
  }
  func.func @transform_2(%arg0: i32) -> (i32, i32) {
    %c0_i32 = arith.constant 0 : i32
    %c0_i32_0 = arith.constant 0 : i32
    %c0_i32_1 = arith.constant 0 : i32
    return %c0_i32, %c0_i32_0 : i32, i32
  }
  func.func @transform_3(%arg0: i32) -> (i32, i32) {
    %c0_i32 = arith.constant 0 : i32
    %c0_i32_0 = arith.constant 0 : i32
    return %arg0, %c0_i32 : i32, i32
  }
}

module attributes {stable_mosaic.version = 11 : i64} {
  func.func @_flash_attn_kernel(%arg0: i32, %arg1: i32, %arg2: i32, %arg3: memref<1x16x64xf32, #tpu.memory_space<vmem>>, %arg4: memref<1x8x64xf32, #tpu.memory_space<vmem>>, %arg5: memref<1x8x64xf32, #tpu.memory_space<vmem>>, %arg6: memref<1x16x64xf32, #tpu.memory_space<vmem>>, %arg7: memref<16x4xf32, #tpu.memory_space<vmem>>, %arg8: memref<16x4xf32, #tpu.memory_space<vmem>>, %arg9: memref<16x64xf32, #tpu.memory_space<vmem>>) attributes {dimension_semantics = [#tpu.dimension_semantics<parallel>, #tpu.dimension_semantics<parallel>, #tpu.dimension_semantics<arbitrary>], iteration_bounds = array<i64: 2, 1, 1>, scalar_prefetch = 0 : i64, scratch_operands = 3 : i64, tpu.core_type = #tpu.core_type<tc>, window_params = [{transform_indices = @transform_0, window_bounds = array<i64: 1, 16, 64>}, {transform_indices = @transform_1, window_bounds = array<i64: 1, 8, 64>}, {transform_indices = @transform_2, window_bounds = array<i64: 1, 8, 64>}, {transform_indices = @transform_3, window_bounds = array<i64: 1, 16, 64>}]} {
    %c0_i32 = arith.constant 0 : i32
    %0 = arith.cmpi eq, %arg2, %c0_i32 : i32
    %1 = arith.extui %0 : i1 to i32
    %c0_i32_0 = arith.constant 0 : i32
    %2 = arith.cmpi ne, %1, %c0_i32_0 : i32
    scf.if %2 {
      %cst_69 = arith.constant 0xFF800000 : f32
      %118 = vector.broadcast %cst_69 : f32 to vector<16x4xf32>
      %c0_70 = arith.constant 0 : index
      %c0_71 = arith.constant 0 : index
      %119 = vector.load %arg7[%c0_70, %c0_71] : memref<16x4xf32, #tpu.memory_space<vmem>>, vector<16x4xf32>
      tpu.vector_store %arg7[%c0_70, %c0_71], %118 {strides = array<i32>} : memref<16x4xf32, #tpu.memory_space<vmem>>, vector<16x4xf32>,
      %cst_72 = arith.constant 0.000000e+00 : f32
      %120 = vector.broadcast %cst_72 : f32 to vector<16x4xf32>
      %c0_73 = arith.constant 0 : index
      %c0_74 = arith.constant 0 : index
      %121 = vector.load %arg8[%c0_73, %c0_74] : memref<16x4xf32, #tpu.memory_space<vmem>>, vector<16x4xf32>
      tpu.vector_store %arg8[%c0_73, %c0_74], %120 {strides = array<i32>} : memref<16x4xf32, #tpu.memory_space<vmem>>, vector<16x4xf32>,
      %cst_75 = arith.constant 0.000000e+00 : f32
      %122 = vector.broadcast %cst_75 : f32 to vector<16x64xf32>
      %c0_76 = arith.constant 0 : index
      %c0_77 = arith.constant 0 : index
      %123 = vector.load %arg9[%c0_76, %c0_77] : memref<16x64xf32, #tpu.memory_space<vmem>>, vector<16x64xf32>
      tpu.vector_store %arg9[%c0_76, %c0_77], %122 {strides = array<i32>} : memref<16x64xf32, #tpu.memory_space<vmem>>, vector<16x64xf32>,
    } else {
    }
    %c0 = arith.constant 0 : index
    %c0_1 = arith.constant 0 : index
    %c0_2 = arith.constant 0 : index
    %3 = vector.load %arg3[%c0, %c0_1, %c0_2] : memref<1x16x64xf32, #tpu.memory_space<vmem>>, vector<1x16x64xf32>
    %4 = vector.shape_cast %3 : vector<1x16x64xf32> to vector<16x64xf32>
    %cst = arith.constant 2.500000e-01 : f32
    %5 = vector.broadcast %cst : f32 to vector<16x64xf32>
    %6 = arith.mulf %4, %5 : vector<16x64xf32>
    %c0_3 = arith.constant 0 : index
    %c0_4 = arith.constant 0 : index
    %c0_5 = arith.constant 0 : index
    %7 = vector.load %arg4[%c0_3, %c0_4, %c0_5] : memref<1x8x64xf32, #tpu.memory_space<vmem>>, vector<1x8x64xf32>
    %8 = vector.shape_cast %7 : vector<1x8x64xf32> to vector<8x64xf32>
    %c0_6 = arith.constant 0 : index
    %c0_7 = arith.constant 0 : index
    %c0_8 = arith.constant 0 : index
    %9 = vector.load %arg5[%c0_6, %c0_7, %c0_8] : memref<1x8x64xf32, #tpu.memory_space<vmem>>, vector<1x8x64xf32>
    %10 = vector.shape_cast %9 : vector<1x8x64xf32> to vector<8x64xf32>
    %11 = vector.extract_strided_slice %6 {offsets = [0, 0], sizes = [16, 16], strides = [1, 1]} : vector<16x64xf32> to vector<16x16xf32>
    %12 = vector.extract_strided_slice %8 {offsets = [0, 0], sizes = [8, 16], strides = [1, 1]} : vector<8x64xf32> to vector<8x16xf32>
    %cst_9 = arith.constant dense<0.000000e+00> : vector<16x8xf32>
    %13 = tpu.matmul %11, %12, %cst_9 {dimension_numbers = #tpu.dot_dimension_numbers<[1], [1], [0], [0], [0, 0, 1, 0], [], []>} : vector<16x16xf32>, vector<8x16xf32>, vector<16x8xf32> -> vector<16x8xf32>
    %c0_10 = arith.constant 0 : index
    %c0_11 = arith.constant 0 : index
    %14 = vector.load %arg7[%c0_10, %c0_11] : memref<16x4xf32, #tpu.memory_space<vmem>>, vector<16x1xf32>
    %cst_12 = arith.constant dense<0xFF800000> : vector<16xf32>
    %15 = vector.multi_reduction <maximumf>, %13, %cst_12 [1] : vector<16x8xf32> to vector<16xf32>
    %16 = vector.shape_cast %15 : vector<16xf32> to vector<16x1xf32>
    %17 = arith.maximumf %14, %16 : vector<16x1xf32>
    %18 = arith.subf %14, %17 : vector<16x1xf32>
    %19 = math.exp %18 : vector<16x1xf32>
    %20 = vector.broadcast %17 : vector<16x1xf32> to vector<16x8xf32>
    %21 = arith.subf %13, %20 : vector<16x8xf32>
    %22 = math.exp %21 : vector<16x8xf32>
    %cst_13 = arith.constant dense<0.000000e+00> : vector<16xf32>
    %23 = vector.multi_reduction <add>, %22, %cst_13 [1] : vector<16x8xf32> to vector<16xf32>
    %24 = vector.shape_cast %23 : vector<16xf32> to vector<16x1xf32>
    %c0_14 = arith.constant 0 : index
    %c0_15 = arith.constant 0 : index
    %25 = vector.load %arg8[%c0_14, %c0_15] : memref<16x4xf32, #tpu.memory_space<vmem>>, vector<16x1xf32>
    %26 = arith.mulf %19, %25 : vector<16x1xf32>
    %27 = arith.addf %26, %24 : vector<16x1xf32>
    %c0_16 = arith.constant 0 : index
    %c0_17 = arith.constant 0 : index
    %28 = vector.load %arg8[%c0_16, %c0_17] : memref<16x4xf32, #tpu.memory_space<vmem>>, vector<16x1xf32>
    tpu.vector_store %arg8[%c0_16, %c0_17], %27 {strides = array<i32>} : memref<16x4xf32, #tpu.memory_space<vmem>>, vector<16x1xf32>,
    %c0_18 = arith.constant 0 : index
    %c0_19 = arith.constant 0 : index
    %29 = vector.load %arg9[%c0_18, %c0_19] : memref<16x64xf32, #tpu.memory_space<vmem>>, vector<16x16xf32>
    %30 = vector.broadcast %19 : vector<16x1xf32> to vector<16x16xf32>
    %31 = arith.mulf %30, %29 : vector<16x16xf32>
    %32 = vector.extract_strided_slice %10 {offsets = [0, 0], sizes = [8, 16], strides = [1, 1]} : vector<8x64xf32> to vector<8x16xf32>
    %cst_20 = arith.constant dense<0.000000e+00> : vector<16x16xf32>
    %33 = tpu.matmul %22, %32, %cst_20 {dimension_numbers = #tpu.dot_dimension_numbers<[1], [0], [0], [1], [0, 0, 1, 1], [], []>} : vector<16x8xf32>, vector<8x16xf32>, vector<16x16xf32> -> vector<16x16xf32>
    %34 = arith.addf %31, %33 : vector<16x16xf32>
    %c0_21 = arith.constant 0 : index
    %c0_22 = arith.constant 0 : index
    %35 = vector.load %arg9[%c0_21, %c0_22] : memref<16x64xf32, #tpu.memory_space<vmem>>, vector<16x16xf32>
    tpu.vector_store %arg9[%c0_21, %c0_22], %34 {strides = array<i32>} : memref<16x64xf32, #tpu.memory_space<vmem>>, vector<16x16xf32>,
    %c0_23 = arith.constant 0 : index
    %c0_24 = arith.constant 0 : index
    %36 = vector.load %arg7[%c0_23, %c0_24] : memref<16x4xf32, #tpu.memory_space<vmem>>, vector<16x1xf32>
    tpu.vector_store %arg7[%c0_23, %c0_24], %17 {strides = array<i32>} : memref<16x4xf32, #tpu.memory_space<vmem>>, vector<16x1xf32>,
    %37 = vector.extract_strided_slice %6 {offsets = [0, 16], sizes = [16, 16], strides = [1, 1]} : vector<16x64xf32> to vector<16x16xf32>
    %38 = vector.extract_strided_slice %8 {offsets = [0, 16], sizes = [8, 16], strides = [1, 1]} : vector<8x64xf32> to vector<8x16xf32>
    %cst_25 = arith.constant dense<0.000000e+00> : vector<16x8xf32>
    %39 = tpu.matmul %37, %38, %cst_25 {dimension_numbers = #tpu.dot_dimension_numbers<[1], [1], [0], [0], [0, 0, 1, 0], [], []>} : vector<16x16xf32>, vector<8x16xf32>, vector<16x8xf32> -> vector<16x8xf32>
    %c0_26 = arith.constant 0 : index
    %c1 = arith.constant 1 : index
    %40 = vector.load %arg7[%c0_26, %c1] : memref<16x4xf32, #tpu.memory_space<vmem>>, vector<16x1xf32>
    %cst_27 = arith.constant dense<0xFF800000> : vector<16xf32>
    %41 = vector.multi_reduction <maximumf>, %39, %cst_27 [1] : vector<16x8xf32> to vector<16xf32>
    %42 = vector.shape_cast %41 : vector<16xf32> to vector<16x1xf32>
    %43 = arith.maximumf %40, %42 : vector<16x1xf32>
    %44 = arith.subf %40, %43 : vector<16x1xf32>
    %45 = math.exp %44 : vector<16x1xf32>
    %46 = vector.broadcast %43 : vector<16x1xf32> to vector<16x8xf32>
    %47 = arith.subf %39, %46 : vector<16x8xf32>
    %48 = math.exp %47 : vector<16x8xf32>
    %cst_28 = arith.constant dense<0.000000e+00> : vector<16xf32>
    %49 = vector.multi_reduction <add>, %48, %cst_28 [1] : vector<16x8xf32> to vector<16xf32>
    %50 = vector.shape_cast %49 : vector<16xf32> to vector<16x1xf32>
    %c0_29 = arith.constant 0 : index
    %c1_30 = arith.constant 1 : index
    %51 = vector.load %arg8[%c0_29, %c1_30] : memref<16x4xf32, #tpu.memory_space<vmem>>, vector<16x1xf32>
    %52 = arith.mulf %45, %51 : vector<16x1xf32>
    %53 = arith.addf %52, %50 : vector<16x1xf32>
    %c0_31 = arith.constant 0 : index
    %c1_32 = arith.constant 1 : index
    %54 = vector.load %arg8[%c0_31, %c1_32] : memref<16x4xf32, #tpu.memory_space<vmem>>, vector<16x1xf32>
    tpu.vector_store %arg8[%c0_31, %c1_32], %53 {strides = array<i32>} : memref<16x4xf32, #tpu.memory_space<vmem>>, vector<16x1xf32>,
    %c0_33 = arith.constant 0 : index
    %c16 = arith.constant 16 : index
    %55 = vector.load %arg9[%c0_33, %c16] : memref<16x64xf32, #tpu.memory_space<vmem>>, vector<16x16xf32>
    %56 = vector.broadcast %45 : vector<16x1xf32> to vector<16x16xf32>
    %57 = arith.mulf %56, %55 : vector<16x16xf32>
    %58 = vector.extract_strided_slice %10 {offsets = [0, 16], sizes = [8, 16], strides = [1, 1]} : vector<8x64xf32> to vector<8x16xf32>
    %cst_34 = arith.constant dense<0.000000e+00> : vector<16x16xf32>
    %59 = tpu.matmul %48, %58, %cst_34 {dimension_numbers = #tpu.dot_dimension_numbers<[1], [0], [0], [1], [0, 0, 1, 1], [], []>} : vector<16x8xf32>, vector<8x16xf32>, vector<16x16xf32> -> vector<16x16xf32>
    %60 = arith.addf %57, %59 : vector<16x16xf32>
    %c0_35 = arith.constant 0 : index
    %c16_36 = arith.constant 16 : index
    %61 = vector.load %arg9[%c0_35, %c16_36] : memref<16x64xf32, #tpu.memory_space<vmem>>, vector<16x16xf32>
    tpu.vector_store %arg9[%c0_35, %c16_36], %60 {strides = array<i32>} : memref<16x64xf32, #tpu.memory_space<vmem>>, vector<16x16xf32>,
    %c0_37 = arith.constant 0 : index
    %c1_38 = arith.constant 1 : index
    %62 = vector.load %arg7[%c0_37, %c1_38] : memref<16x4xf32, #tpu.memory_space<vmem>>, vector<16x1xf32>
    tpu.vector_store %arg7[%c0_37, %c1_38], %43 {strides = array<i32>} : memref<16x4xf32, #tpu.memory_space<vmem>>, vector<16x1xf32>,
    %63 = vector.extract_strided_slice %6 {offsets = [0, 32], sizes = [16, 16], strides = [1, 1]} : vector<16x64xf32> to vector<16x16xf32>
    %64 = vector.extract_strided_slice %8 {offsets = [0, 32], sizes = [8, 16], strides = [1, 1]} : vector<8x64xf32> to vector<8x16xf32>
    %cst_39 = arith.constant dense<0.000000e+00> : vector<16x8xf32>
    %65 = tpu.matmul %63, %64, %cst_39 {dimension_numbers = #tpu.dot_dimension_numbers<[1], [1], [0], [0], [0, 0, 1, 0], [], []>} : vector<16x16xf32>, vector<8x16xf32>, vector<16x8xf32> -> vector<16x8xf32>
    %c0_40 = arith.constant 0 : index
    %c2 = arith.constant 2 : index
    %66 = vector.load %arg7[%c0_40, %c2] : memref<16x4xf32, #tpu.memory_space<vmem>>, vector<16x1xf32>
    %cst_41 = arith.constant dense<0xFF800000> : vector<16xf32>
    %67 = vector.multi_reduction <maximumf>, %65, %cst_41 [1] : vector<16x8xf32> to vector<16xf32>
    %68 = vector.shape_cast %67 : vector<16xf32> to vector<16x1xf32>
    %69 = arith.maximumf %66, %68 : vector<16x1xf32>
    %70 = arith.subf %66, %69 : vector<16x1xf32>
    %71 = math.exp %70 : vector<16x1xf32>
    %72 = vector.broadcast %69 : vector<16x1xf32> to vector<16x8xf32>
    %73 = arith.subf %65, %72 : vector<16x8xf32>
    %74 = math.exp %73 : vector<16x8xf32>
    %cst_42 = arith.constant dense<0.000000e+00> : vector<16xf32>
    %75 = vector.multi_reduction <add>, %74, %cst_42 [1] : vector<16x8xf32> to vector<16xf32>
    %76 = vector.shape_cast %75 : vector<16xf32> to vector<16x1xf32>
    %c0_43 = arith.constant 0 : index
    %c2_44 = arith.constant 2 : index
    %77 = vector.load %arg8[%c0_43, %c2_44] : memref<16x4xf32, #tpu.memory_space<vmem>>, vector<16x1xf32>
    %78 = arith.mulf %71, %77 : vector<16x1xf32>
    %79 = arith.addf %78, %76 : vector<16x1xf32>
    %c0_45 = arith.constant 0 : index
    %c2_46 = arith.constant 2 : index
    %80 = vector.load %arg8[%c0_45, %c2_46] : memref<16x4xf32, #tpu.memory_space<vmem>>, vector<16x1xf32>
    tpu.vector_store %arg8[%c0_45, %c2_46], %79 {strides = array<i32>} : memref<16x4xf32, #tpu.memory_space<vmem>>, vector<16x1xf32>,
    %c0_47 = arith.constant 0 : index
    %c32 = arith.constant 32 : index
    %81 = vector.load %arg9[%c0_47, %c32] : memref<16x64xf32, #tpu.memory_space<vmem>>, vector<16x16xf32>
    %82 = vector.broadcast %71 : vector<16x1xf32> to vector<16x16xf32>
    %83 = arith.mulf %82, %81 : vector<16x16xf32>
    %84 = vector.extract_strided_slice %10 {offsets = [0, 32], sizes = [8, 16], strides = [1, 1]} : vector<8x64xf32> to vector<8x16xf32>
    %cst_48 = arith.constant dense<0.000000e+00> : vector<16x16xf32>
    %85 = tpu.matmul %74, %84, %cst_48 {dimension_numbers = #tpu.dot_dimension_numbers<[1], [0], [0], [1], [0, 0, 1, 1], [], []>} : vector<16x8xf32>, vector<8x16xf32>, vector<16x16xf32> -> vector<16x16xf32>
    %86 = arith.addf %83, %85 : vector<16x16xf32>
    %c0_49 = arith.constant 0 : index
    %c32_50 = arith.constant 32 : index
    %87 = vector.load %arg9[%c0_49, %c32_50] : memref<16x64xf32, #tpu.memory_space<vmem>>, vector<16x16xf32>
    tpu.vector_store %arg9[%c0_49, %c32_50], %86 {strides = array<i32>} : memref<16x64xf32, #tpu.memory_space<vmem>>, vector<16x16xf32>,
    %c0_51 = arith.constant 0 : index
    %c2_52 = arith.constant 2 : index
    %88 = vector.load %arg7[%c0_51, %c2_52] : memref<16x4xf32, #tpu.memory_space<vmem>>, vector<16x1xf32>
    tpu.vector_store %arg7[%c0_51, %c2_52], %69 {strides = array<i32>} : memref<16x4xf32, #tpu.memory_space<vmem>>, vector<16x1xf32>,
    %89 = vector.extract_strided_slice %6 {offsets = [0, 48], sizes = [16, 16], strides = [1, 1]} : vector<16x64xf32> to vector<16x16xf32>
    %90 = vector.extract_strided_slice %8 {offsets = [0, 48], sizes = [8, 16], strides = [1, 1]} : vector<8x64xf32> to vector<8x16xf32>
    %cst_53 = arith.constant dense<0.000000e+00> : vector<16x8xf32>
    %91 = tpu.matmul %89, %90, %cst_53 {dimension_numbers = #tpu.dot_dimension_numbers<[1], [1], [0], [0], [0, 0, 1, 0], [], []>} : vector<16x16xf32>, vector<8x16xf32>, vector<16x8xf32> -> vector<16x8xf32>
    %c0_54 = arith.constant 0 : index
    %c3 = arith.constant 3 : index
    %92 = vector.load %arg7[%c0_54, %c3] : memref<16x4xf32, #tpu.memory_space<vmem>>, vector<16x1xf32>
    %cst_55 = arith.constant dense<0xFF800000> : vector<16xf32>
    %93 = vector.multi_reduction <maximumf>, %91, %cst_55 [1] : vector<16x8xf32> to vector<16xf32>
    %94 = vector.shape_cast %93 : vector<16xf32> to vector<16x1xf32>
    %95 = arith.maximumf %92, %94 : vector<16x1xf32>
    %96 = arith.subf %92, %95 : vector<16x1xf32>
    %97 = math.exp %96 : vector<16x1xf32>
    %98 = vector.broadcast %95 : vector<16x1xf32> to vector<16x8xf32>
    %99 = arith.subf %91, %98 : vector<16x8xf32>
    %100 = math.exp %99 : vector<16x8xf32>
    %cst_56 = arith.constant dense<0.000000e+00> : vector<16xf32>
    %101 = vector.multi_reduction <add>, %100, %cst_56 [1] : vector<16x8xf32> to vector<16xf32>
    %102 = vector.shape_cast %101 : vector<16xf32> to vector<16x1xf32>
    %c0_57 = arith.constant 0 : index
    %c3_58 = arith.constant 3 : index
    %103 = vector.load %arg8[%c0_57, %c3_58] : memref<16x4xf32, #tpu.memory_space<vmem>>, vector<16x1xf32>
    %104 = arith.mulf %97, %103 : vector<16x1xf32>
    %105 = arith.addf %104, %102 : vector<16x1xf32>
    %c0_59 = arith.constant 0 : index
    %c3_60 = arith.constant 3 : index
    %106 = vector.load %arg8[%c0_59, %c3_60] : memref<16x4xf32, #tpu.memory_space<vmem>>, vector<16x1xf32>
    tpu.vector_store %arg8[%c0_59, %c3_60], %105 {strides = array<i32>} : memref<16x4xf32, #tpu.memory_space<vmem>>, vector<16x1xf32>,
    %c0_61 = arith.constant 0 : index
    %c48 = arith.constant 48 : index
    %107 = vector.load %arg9[%c0_61, %c48] : memref<16x64xf32, #tpu.memory_space<vmem>>, vector<16x16xf32>
    %108 = vector.broadcast %97 : vector<16x1xf32> to vector<16x16xf32>
    %109 = arith.mulf %108, %107 : vector<16x16xf32>
    %110 = vector.extract_strided_slice %10 {offsets = [0, 48], sizes = [8, 16], strides = [1, 1]} : vector<8x64xf32> to vector<8x16xf32>
    %cst_62 = arith.constant dense<0.000000e+00> : vector<16x16xf32>
    %111 = tpu.matmul %100, %110, %cst_62 {dimension_numbers = #tpu.dot_dimension_numbers<[1], [0], [0], [1], [0, 0, 1, 1], [], []>} : vector<16x8xf32>, vector<8x16xf32>, vector<16x16xf32> -> vector<16x16xf32>
    %112 = arith.addf %109, %111 : vector<16x16xf32>
    %c0_63 = arith.constant 0 : index
    %c48_64 = arith.constant 48 : index
    %113 = vector.load %arg9[%c0_63, %c48_64] : memref<16x64xf32, #tpu.memory_space<vmem>>, vector<16x16xf32>
    tpu.vector_store %arg9[%c0_63, %c48_64], %112 {strides = array<i32>} : memref<16x64xf32, #tpu.memory_space<vmem>>, vector<16x16xf32>,
    %c0_65 = arith.constant 0 : index
    %c3_66 = arith.constant 3 : index
    %114 = vector.load %arg7[%c0_65, %c3_66] : memref<16x4xf32, #tpu.memory_space<vmem>>, vector<16x1xf32>
    tpu.vector_store %arg7[%c0_65, %c3_66], %95 {strides = array<i32>} : memref<16x4xf32, #tpu.memory_space<vmem>>, vector<16x1xf32>,
    %c0_i32_67 = arith.constant 0 : i32
    %115 = arith.cmpi eq, %arg2, %c0_i32_67 : i32
    %116 = arith.extui %115 : i1 to i32
    %c0_i32_68 = arith.constant 0 : i32
    %117 = arith.cmpi ne, %116, %c0_i32_68 : i32
    scf.if %117 {
      %c0_69 = arith.constant 0 : index
      %c0_70 = arith.constant 0 : index
      %118 = vector.load %arg8[%c0_69, %c0_70] : memref<16x4xf32, #tpu.memory_space<vmem>>, vector<16x4xf32>
      %119 = tpu.reciprocal %118 {approx = true} : vector<16x4xf32> -> vector<16x4xf32>
      %c0_71 = arith.constant 0 : index
      %c0_72 = arith.constant 0 : index
      %120 = vector.load %arg9[%c0_71, %c0_72] : memref<16x64xf32, #tpu.memory_space<vmem>>, vector<16x16xf32>
      %121 = vector.extract_strided_slice %119 {offsets = [0, 0], sizes = [16, 1], strides = [1, 1]} : vector<16x4xf32> to vector<16x1xf32>
      %122 = vector.broadcast %121 : vector<16x1xf32> to vector<16x16xf32>
      %123 = arith.mulf %120, %122 : vector<16x16xf32>
      %c0_73 = arith.constant 0 : index
      %c0_74 = arith.constant 0 : index
      %124 = vector.load %arg9[%c0_73, %c0_74] : memref<16x64xf32, #tpu.memory_space<vmem>>, vector<16x16xf32>
      tpu.vector_store %arg9[%c0_73, %c0_74], %123 {strides = array<i32>} : memref<16x64xf32, #tpu.memory_space<vmem>>, vector<16x16xf32>,
      %c0_75 = arith.constant 0 : index
      %c16_76 = arith.constant 16 : index
      %125 = vector.load %arg9[%c0_75, %c16_76] : memref<16x64xf32, #tpu.memory_space<vmem>>, vector<16x16xf32>
      %126 = vector.extract_strided_slice %119 {offsets = [0, 1], sizes = [16, 1], strides = [1, 1]} : vector<16x4xf32> to vector<16x1xf32>
      %127 = vector.broadcast %126 : vector<16x1xf32> to vector<16x16xf32>
      %128 = arith.mulf %125, %127 : vector<16x16xf32>
      %c0_77 = arith.constant 0 : index
      %c16_78 = arith.constant 16 : index
      %129 = vector.load %arg9[%c0_77, %c16_78] : memref<16x64xf32, #tpu.memory_space<vmem>>, vector<16x16xf32>
      tpu.vector_store %arg9[%c0_77, %c16_78], %128 {strides = array<i32>} : memref<16x64xf32, #tpu.memory_space<vmem>>, vector<16x16xf32>,
      %c0_79 = arith.constant 0 : index
      %c32_80 = arith.constant 32 : index
      %130 = vector.load %arg9[%c0_79, %c32_80] : memref<16x64xf32, #tpu.memory_space<vmem>>, vector<16x16xf32>
      %131 = vector.extract_strided_slice %119 {offsets = [0, 2], sizes = [16, 1], strides = [1, 1]} : vector<16x4xf32> to vector<16x1xf32>
      %132 = vector.broadcast %131 : vector<16x1xf32> to vector<16x16xf32>
      %133 = arith.mulf %130, %132 : vector<16x16xf32>
      %c0_81 = arith.constant 0 : index
      %c32_82 = arith.constant 32 : index
      %134 = vector.load %arg9[%c0_81, %c32_82] : memref<16x64xf32, #tpu.memory_space<vmem>>, vector<16x16xf32>
      tpu.vector_store %arg9[%c0_81, %c32_82], %133 {strides = array<i32>} : memref<16x64xf32, #tpu.memory_space<vmem>>, vector<16x16xf32>,
      %c0_83 = arith.constant 0 : index
      %c48_84 = arith.constant 48 : index
      %135 = vector.load %arg9[%c0_83, %c48_84] : memref<16x64xf32, #tpu.memory_space<vmem>>, vector<16x16xf32>
      %136 = vector.extract_strided_slice %119 {offsets = [0, 3], sizes = [16, 1], strides = [1, 1]} : vector<16x4xf32> to vector<16x1xf32>
      %137 = vector.broadcast %136 : vector<16x1xf32> to vector<16x16xf32>
      %138 = arith.mulf %135, %137 : vector<16x16xf32>
      %c0_85 = arith.constant 0 : index
      %c48_86 = arith.constant 48 : index
      %139 = vector.load %arg9[%c0_85, %c48_86] : memref<16x64xf32, #tpu.memory_space<vmem>>, vector<16x16xf32>
      tpu.vector_store %arg9[%c0_85, %c48_86], %138 {strides = array<i32>} : memref<16x64xf32, #tpu.memory_space<vmem>>, vector<16x16xf32>,
      %c0_87 = arith.constant 0 : index
      %c0_88 = arith.constant 0 : index
      %140 = vector.load %arg9[%c0_87, %c0_88] : memref<16x64xf32, #tpu.memory_space<vmem>>, vector<16x64xf32>
      %c0_89 = arith.constant 0 : index
      %c0_90 = arith.constant 0 : index
      %c0_91 = arith.constant 0 : index
      %141 = vector.load %arg6[%c0_89, %c0_90, %c0_91] : memref<1x16x64xf32, #tpu.memory_space<vmem>>, vector<1x16x64xf32>
      %142 = vector.shape_cast %141 : vector<1x16x64xf32> to vector<16x64xf32>
      %143 = vector.shape_cast %140 : vector<16x64xf32> to vector<1x16x64xf32>
      tpu.vector_store %arg6[%c0_89, %c0_90, %c0_91], %143 {strides = array<i32>} : memref<1x16x64xf32, #tpu.memory_space<vmem>>, vector<1x16x64xf32>,
    } else {
    }
    return
  }
  func.func @transform_0(%arg0: i32, %arg1: i32, %arg2: i32) -> (i32, i32, i32) {
    %c0_i32 = arith.constant 0 : i32
    %c0_i32_0 = arith.constant 0 : i32
    return %arg0, %arg1, %c0_i32 : i32, i32, i32
  }
  func.func @transform_1(%arg0: i32, %arg1: i32, %arg2: i32) -> (i32, i32, i32) {
    %c0_i32 = arith.constant 0 : i32
    %c0_i32_0 = arith.constant 0 : i32
    return %arg0, %arg2, %c0_i32 : i32, i32, i32
  }
  func.func @transform_2(%arg0: i32, %arg1: i32, %arg2: i32) -> (i32, i32, i32) {
    %c0_i32 = arith.constant 0 : i32
    %c0_i32_0 = arith.constant 0 : i32
    return %arg0, %arg2, %c0_i32 : i32, i32, i32
  }
  func.func @transform_3(%arg0: i32, %arg1: i32, %arg2: i32) -> (i32, i32, i32) {
    %c0_i32 = arith.constant 0 : i32
    %c0_i32_0 = arith.constant 0 : i32
    return %arg0, %arg1, %c0_i32 : i32, i32, i32
  }
}

</mosaic_0001>

<bundles_post_ra>
// kernel: memory_efficient_cross_attention.5
= control target key start
LH: loop header
LB: loop body
LE: loop exit
PB: predicated region body
PF: predicated region fallthrough
CT: control target
= control target key end

     0   :  { %vm19_vm0 = vcmask 392192   ;;  %s179_s1 = inlined_call_operand.vmem [shape: f32[48,128], index: 1, kind: input, shape index: {}]   ;;  %s180_s0 = inlined_call_operand.vmem [shape: f32[16,48], index: 0, kind: input, shape index: {}]   ;;  %s181_s2 = inlined_call_operand.vmem [shape: f32[16,128], index: 2, kind: output, shape index: {}]  }
   0x1   :  { %v18_v0 = vld [vmem:[%s179_s1 + $0x28] sm:$0xff]  ;;  %v17_v1 = vld [vmem:[%s179_s1 + $0x20] sm:$0xff]  ;;  %v16_v2 = vld [vmem:[%s179_s1 + $0x18] sm:$0xff] }
   0x2   :  { %117 = vmatprep.subr.mxu0 %v18_v0  ;;  %v11_v3 = vld [vmem:[%s180_s0] sm:$0xff]  ;;  %v15_v4 = vld [vmem:[%s179_s1 + $0x10] sm:$0xff]  ;;  %v14_v5 = vld [vmem:[%s179_s1 + $0x8] sm:$0xff] }
   0x3   :  { %118 = vmatpush3.msra.mxu0 %v18_v0  ;;  %129 = vmatprep.mubr.msk.f32.mxu0 %vm19_vm0, %v11_v3  ;;  %v13_v6 = vld [vmem:[%s179_s1] sm:$0xff]  ;;  %v12_v7 = vld [vmem:[%s180_s0 + $0x8] sm:$0xff] }
   0x4   :  { %119 = vmatprep.subr.mxu0 %v17_v1 }
   0x5   :  { %120 = vmatpush3.msra.mxu0 %v17_v1 }
   0x6   :  { %121 = vmatprep.subr.mxu0 %v16_v2 }
   0x7   :  { %122 = vmatpush3.msra.mxu0 %v16_v2 }
   0x8   :  { %123 = vmatprep.subr.mxu0 %v15_v4 }
   0x9   :  { %124 = vmatpush3.msra.mxu0 %v15_v4 }
   0xa   :  { %125 = vmatprep.subr.mxu0 %v14_v5 }
   0xb   :  { %126 = vmatpush3.msra.mxu0 %v14_v5 }
   0xc   :  { %127 = vmatprep.subr.mxu0 %v13_v6 }
   0xd   :  { %128 = vmatpush3.msra.mxu0 %v13_v6 }
   0xe   :  { %130 = vmatmul.mubr.msk.f32.vlgmr.msra.gmra.mxu0 %vm19_vm0, %v12_v7 }
  0xce   :  { %v131_v8 = vpop.f32.mrf.mxu0 }
  0xcf   :  { %102 = vst [vmem:[%s181_s2 + $0x8] sm:$0xff] %v131_v8 }
  0xd0   :  { %v92_v9 = vpop.f32.mrf.mxu0 }
  0xd1   :  { %101 = vst [vmem:[%s181_s2] sm:$0xff] %v92_v9 }

// kernel: memory_efficient_cross_attention.4
= control target key start
LH: loop header
LB: loop body
LE: loop exit
PB: predicated region body
PF: predicated region fallthrough
CT: control target
= control target key end

     0   :  { %7 = vsyncpa [#allocation3], 0  ;;  %s275_s0 = inlined_call_operand.hbm [shape: f32[32,32], index: 0, kind: input, shape index: {}]   ;;  %s276_s1 = inlined_call_operand.hbm [shape: f32[32,64], index: 1, kind: input, shape index: {}]   ;;  %s277_s2 = inlined_call_operand.vmem [shape: f32[32,64], index: 2, kind: output, shape index: {}]  }
   0x1   :  { %8 = vsyncpa [#allocation5], 0  ;;  %s238_s9 = smov [#allocation2]  }
   0x2   :  { %s14_s10 = sshll.u32 %s238_s9, 4  ;;  %s15_s10 = int_to_ptr.vmem [resolvable:$true] %s14_s10 }
   0x3   :  { %s202_s11 = scalar_lea.vmem %s15_s10, 512  ;;  %p207_p1 = scmp.lt.s32.totalorder %s15_s10, %s15_s10 }
   0x4   :  { %p203_p0 = scmp.ne.s32.totalorder %s15_s10, %s202_s11  ;;  %p208_p2 = scmp.lt.s32.totalorder %s202_s11, %s202_s11 }
   0x6   :  { %p209_p3 = por %p208_p2, %p207_p1 }
   0x8   :  { %p210_p4 = pnand %p209_p3, %p203_p0 }
   0xa   :  { %213 = shalt.err (!%p210_p4)
}
   0xb   :  { %s239_s12 = smov 128   ;;  %s240_s13 = smov 8  }
   0xc   :  { %20 = dma.hbm_to_vmem [thread:$0]  %s275_s0, 512, %s15_s10, [#allocation3], %s239_s12, %s239_s12, %s240_s13  }
   0xd   :  { %s241_s16 = smov [#allocation4]  }
   0xe   :  { %s26_s17 = sshll.u32 %s241_s16, 4  ;;  %s27_s17 = int_to_ptr.vmem [resolvable:$true] %s26_s17 }
   0xf   :  { %s222_s18 = scalar_lea.vmem %s27_s17, 512  ;;  %p227_p6 = scmp.lt.s32.totalorder %s27_s17, %s27_s17 }
  0x10   :  { %p223_p5 = scmp.ne.s32.totalorder %s27_s17, %s222_s18  ;;  %p228_p7 = scmp.lt.s32.totalorder %s222_s18, %s222_s18 }
  0x12   :  { %p229_p8 = por %p228_p7, %p227_p6 }
  0x14   :  { %p230_p9 = pnand %p229_p8, %p223_p5 }
  0x16   :  { %233 = shalt.err (!%p230_p9)
}
  0x17   :  { %32 = dma.hbm_to_vmem [thread:$0]  %s276_s1, 512, %s27_s17, [#allocation5], %s239_s12, %s239_s12, %s240_s13  }
  0x18   :  { %234 = dma.done.wait [#allocation3], 512  }
  0x19   :  { %235 = vsyncadd [#allocation3], 4294966784 }
  0x1a   :  { %236 = dma.done.wait [#allocation5], 512  }
  0x1b   :  { %237 = vsyncadd [#allocation5], 4294966784  ;;  %v46_v0 = vld [vmem:[#allocation4 + $0x18] sm:$0xff]  ;;  %v45_v1 = vld [vmem:[#allocation4 + $0x10] sm:$0xff]  ;;  %vm47_vm0 = vcmask 261120   ;;  %vm145_vm1 = vcmask 523264  }
  0x1c   :  { %168 = vmatprep.subr.mxu0 %v46_v0  ;;  %182 = vmatprep.subr.mxu1 %v46_v0  ;;  %v44_v2 = vld [vmem:[#allocation4 + $0x8] sm:$0xff]  ;;  %v43_v3 = vld [vmem:[#allocation4] sm:$0xff]  ;;  %v41_v5 = vld [vmem:[#allocation2 + $0x10] sm:$0xff] }
  0x1d   :  { %169 = vmatpush3.msra.mxu0 %v46_v0  ;;  %186 = vmatpush3.msra.mxu1 %v46_v0  ;;  %v39_v4 = vld [vmem:[#allocation2] sm:$0xff]  ;;  %v40_v6 = vld [vmem:[#allocation2 + $0x8] sm:$0xff]  ;;  %v42_v7 = vld [vmem:[#allocation2 + $0x18] sm:$0xff] }
  0x1e   :  { %170 = vmatprep.subr.mxu0 %v45_v1  ;;  %183 = vmatprep.subr.mxu1 %v45_v1 }
  0x1f   :  { %171 = vmatpush3.msra.mxu0 %v45_v1  ;;  %187 = vmatpush3.msra.mxu1 %v45_v1 }
  0x20   :  { %172 = vmatprep.subr.mxu0 %v44_v2  ;;  %184 = vmatprep.subr.mxu1 %v44_v2 }
  0x21   :  { %173 = vmatpush3.msra.mxu0 %v44_v2  ;;  %188 = vmatpush3.msra.mxu1 %v44_v2 }
  0x22   :  { %174 = vmatprep.subr.mxu0 %v43_v3  ;;  %185 = vmatprep.subr.mxu1 %v43_v3 }
  0x23   :  { %175 = vmatpush3.msra.mxu0 %v43_v3  ;;  %189 = vmatpush3.msra.mxu1 %v43_v3 }
  0x24   :  { %176 = vmatprep.mubr.msk.f32.mxu0 %vm47_vm0, %v39_v4  ;;  %179 = vmatprep.mubr.msk.f32.mxu1 %vm47_vm0, %v41_v5 }
  0x25   :  { %177 = vmatmul.mubr.msk.f32.vlgmr.msra.gmra.mxu0 %vm47_vm0, %v40_v6  ;;  %180 = vmatmul.mubr.msk.f32.vlgmr.msra.gmra.mxu1 %vm47_vm0, %v42_v7 }
  0xe5   :  { %v178_v8 = vpop.f32.mrf.mxu0  ;;  %v181_v9 = vpop.f32.mrf.mxu1 }
  0xe6   :  { %147 = vst.msk [vmem:[%s277_s2 + $0x8] sm:$0xff] %vm145_vm1, %v178_v8  ;;  %149 = vst.msk [vmem:[%s277_s2 + $0x18] sm:$0xff] %vm145_vm1, %v181_v9 }
  0xe7   :  { %v126_v10 = vpop.f32.mrf.mxu0  ;;  %v136_v11 = vpop.f32.mrf.mxu1 }
  0xe8   :  { %146 = vst.msk [vmem:[%s277_s2] sm:$0xff] %vm145_vm1, %v126_v10  ;;  %148 = vst.msk [vmem:[%s277_s2 + $0x10] sm:$0xff] %vm145_vm1, %v136_v11 }
  0xe9   :  { %154 = vsyncpa [#allocation3], 1 }
  0xea   :  { %155 = vsyncpa [#allocation5], 1 }

// kernel: memory_efficient_cross_attention.7
= control target key start
LH: loop header
LB: loop body
LE: loop exit
PB: predicated region body
PF: predicated region fallthrough
CT: control target
= control target key end

     0   :  { %s298_s0 = inlined_call_operand.vmem [shape: f32[32,64], index: 0, kind: input, shape index: {}]   ;;  %s299_s1 = inlined_call_operand.vmem [shape: f32[64,32], index: 1, kind: input, shape index: {}]   ;;  %s300_s2 = inlined_call_operand.vmem [shape: f32[1,32], index: 2, kind: input, shape index: {}]   ;;  %s301_s3 = inlined_call_operand.hbm [shape: f32[32,32], index: 3, kind: output, shape index: {}]  }
   0x1   :  { %v26_v0 = vld [vmem:[%s299_s1 + $0x38] sm:$0xff]  ;;  %v25_v1 = vld [vmem:[%s299_s1 + $0x30] sm:$0xff]  ;;  %v24_v2 = vld [vmem:[%s299_s1 + $0x28] sm:$0xff] }
   0x2   :  { %170 = vmatprep.subr.mxu0 %v26_v0  ;;  %192 = vmatprep.subr.mxu1 %v26_v0  ;;  %v23_v3 = vld [vmem:[%s299_s1 + $0x20] sm:$0xff] }
   0x3   :  { %171 = vmatpush3.msra.mxu0 %v26_v0  ;;  %200 = vmatpush3.msra.mxu1 %v26_v0 }
   0x4   :  { %172 = vmatprep.subr.mxu0 %v25_v1  ;;  %193 = vmatprep.subr.mxu1 %v25_v1 }
   0x5   :  { %173 = vmatpush3.msra.mxu0 %v25_v1  ;;  %201 = vmatpush3.msra.mxu1 %v25_v1 }
   0x6   :  { %8 = vsyncpa [#allocation3], 0  ;;  %174 = vmatprep.subr.mxu0 %v24_v2  ;;  %194 = vmatprep.subr.mxu1 %v24_v2  ;;  %v22_v4 = vld [vmem:[%s299_s1 + $0x18] sm:$0xff]  ;;  %v21_v5 = vld [vmem:[%s299_s1 + $0x10] sm:$0xff]  ;;  %vm34_vm0 = vcmask 523264   ;;  %s233_s10 = smov [#allocation2]  }
   0x7   :  { %175 = vmatpush3.msra.mxu0 %v24_v2  ;;  %202 = vmatpush3.msra.mxu1 %v24_v2  ;;  %v20_v6 = vld [vmem:[%s299_s1 + $0x8] sm:$0xff]  ;;  %v19_v7 = vld [vmem:[%s299_s1] sm:$0xff]  ;;  %v17_v9 = vld [vmem:[%s298_s0 + $0x10] sm:$0xff]  ;;  %s142_s11 = sshll.u32 %s233_s10, 4  ;;  %vm132_vm1 = vcmask 261120   ;;  %s143_s11 = int_to_ptr.vmem [resolvable:$true] %s142_s11 }
   0x8   :  { %176 = vmatprep.subr.mxu0 %v23_v3  ;;  %195 = vmatprep.subr.mxu1 %v23_v3  ;;  %v15_v8 = vld [vmem:[%s298_s0] sm:$0xff]  ;;  %v16_v10 = vld [vmem:[%s298_s0 + $0x8] sm:$0xff]  ;;  %v18_v11 = vld [vmem:[%s298_s0 + $0x18] sm:$0xff]  ;;  %s211_s0 = scalar_lea.vmem %s143_s11, 512  ;;  %p216_p1 = scmp.lt.s32.totalorder %s143_s11, %s143_s11 }
   0x9   :  { %177 = vmatpush3.msra.mxu0 %v23_v3  ;;  %203 = vmatpush3.msra.mxu1 %v23_v3  ;;  %v153_v12 = vld [vmem:[%s300_s2] ss:$0 sm:$0xff]  ;;  %p212_p0 = scmp.ne.s32.totalorder %s143_s11, %s211_s0  ;;  %p217_p2 = scmp.lt.s32.totalorder %s211_s0, %s211_s0 }
   0xa   :  { %178 = vmatprep.subr.mxu0 %v22_v4  ;;  %196 = vmatprep.subr.mxu1 %v22_v4 }
   0xb   :  { %179 = vmatpush3.msra.mxu0 %v22_v4  ;;  %204 = vmatpush3.msra.mxu1 %v22_v4  ;;  %p218_p3 = por %p217_p2, %p216_p1 }
   0xc   :  { %180 = vmatprep.subr.mxu0 %v21_v5  ;;  %197 = vmatprep.subr.mxu1 %v21_v5 }
   0xd   :  { %181 = vmatpush3.msra.mxu0 %v21_v5  ;;  %205 = vmatpush3.msra.mxu1 %v21_v5  ;;  %p219_p4 = pnand %p218_p3, %p212_p0 }
   0xe   :  { %182 = vmatprep.subr.mxu0 %v20_v6  ;;  %198 = vmatprep.subr.mxu1 %v20_v6 }
   0xf   :  { %183 = vmatpush3.msra.mxu0 %v20_v6  ;;  %206 = vmatpush3.msra.mxu1 %v20_v6 }
  0x10   :  { %184 = vmatprep.subr.mxu0 %v19_v7  ;;  %199 = vmatprep.subr.mxu1 %v19_v7 }
  0x11   :  { %185 = vmatpush3.msra.mxu0 %v19_v7  ;;  %207 = vmatpush3.msra.mxu1 %v19_v7 }
  0x12   :  { %186 = vmatprep.mubr.msk.f32.mxu0 %vm34_vm0, %v15_v8  ;;  %189 = vmatprep.mubr.msk.f32.mxu1 %vm34_vm0, %v17_v9 }
  0x13   :  { %187 = vmatmul.mubr.msk.f32.vlgmr.msra.gmra.mxu0 %vm34_vm0, %v16_v10  ;;  %190 = vmatmul.mubr.msk.f32.vlgmr.msra.gmra.mxu1 %vm34_vm0, %v18_v11 }
  0xd3   :  { %v188_v13 = vpop.f32.mrf.mxu0  ;;  %v191_v14 = vpop.f32.mrf.mxu1 }
  0xd4   :  { %v119_v15 = vadd.f32 %v188_v13, %v153_v12  ;;  %v129_v16 = vadd.f32 %v191_v14, %v153_v12 }
  0xd5   :  { %v113_v17 = vpop.f32.mrf.mxu0  ;;  %v123_v18 = vpop.f32.mrf.mxu1 }
  0xd6   :  { %134 = vst.msk [vmem:[#allocation2 + $0x8] sm:$0xff] %vm132_vm1, %v119_v15  ;;  %136 = vst.msk [vmem:[#allocation2 + $0x18] sm:$0xff] %vm132_vm1, %v129_v16  ;;  %v114_v19 = vadd.f32 %v153_v12, %v113_v17  ;;  %v124_v20 = vadd.f32 %v153_v12, %v123_v18 }
  0xd8   :  { %133 = vst.msk [vmem:[#allocation2] sm:$0xff] %vm132_vm1, %v114_v19  ;;  %135 = vst.msk [vmem:[#allocation2 + $0x10] sm:$0xff] %vm132_vm1, %v124_v20 }
  0xd9   :  { %222 = shalt.err (!%p219_p4)
}
  0xda   :  { %s234_s2 = smov 128   ;;  %s235_s12 = smov 8  }
  0xdb   :  { %148 = dma.vmem_to_hbm [thread:$0]  %s143_s11, 512, %s301_s3, [#allocation3], %s234_s2, %s234_s2, %s235_s12  }
  0xdc   :  { %231 = dma.done.wait [#allocation3], 512  }
  0xdd   :  { %232 = vsyncadd [#allocation3], 4294966784 }
  0xde   :  { %152 = vsyncpa [#allocation3], 1 }

// kernel: memory_efficient_cross_attention.6
= control target key start
LH: loop header
LB: loop body
LE: loop exit
PB: predicated region body
PF: predicated region fallthrough
CT: control target
= control target key end

     0   :  { %s1704_s12 = smov 0   ;;  %s1706_s13 = smov 0   ;;  %s2016_s0 = inlined_call_operand.vmem [shape: f32[2,16,64], index: 0, kind: input, shape index: {}]   ;;  %s2017_s1 = inlined_call_operand.vmem [shape: f32[2,8,64], index: 1, kind: input, shape index: {}]   ;;  %s2018_s2 = inlined_call_operand.vmem [shape: f32[2,8,64], index: 2, kind: input, shape index: {}]   ;;  %s2019_s3 = inlined_call_operand.vmem [shape: f32[2,16,64], index: 3, kind: output, shape index: {}]  }
   0x1   :  { %s1708_s14 = smov 0  }
   0x2 LB: > { %s32_s15 = sadd.s32 1, %s1666_s13  ;;  %p1461_p0 = scmp.ge.s32.totalorder %s1670_s14, 1  ;;  %s1670_s14 = sphi %s1708_s14, %s13_s14   ;;  %s1666_s13 = sphi %s1706_s13, %s2021_s13   ;;  %s1662_s12 = sphi %s1704_s12, %s2020_s12  }
   0x3   : > { %p34_p1 = scmp.ge.s32.totalorder %s32_s15, 2  ;;  %p193_p2 = scmp.lt.s32.totalorder %s1670_s14, 3 }
   0x5   : > { %s2023_s15 = smov (%p34_p1, %s32_s15), 0  ;;  %p194_p3 = pnand %p1461_p0, %p193_p2 }
   0x6   : > { %p240_p4 = scmp.lt.s32.totalorder (!%p194_p3), %s1662_s12, 1  ;;  %s1675_s24 = smov (!%p194_p3), 112  }
   0x7   : > { %197 = sbr.rel (%p194_p3) target bundleno = 1380 (0x564), region = 32  ;;  %s1676_s25 = smov (!%p194_p3), 80  }
   0x8   : > { %s1677_s29 = smov (!%p194_p3), 96   ;;  %s1681_s30 = smov (!%p194_p3), 16  }
   0x9   : > { %s1682_s4 = smov (!%p194_p3), 32   ;;  %s1683_s5 = smov (!%p194_p3), 48  }
   0xc   : > { %s2025_s12 = smov (!%p240_p4, %s1662_s12), 1  ;;  %vm291_vm0 = vcmask 130048   ;;  %vm277_vm1 = vcmask 31744   ;;  %v1672_v5 = vmov -inf   ;;  %vm378_vm2 = vcmask 64512  }
   0xd   : > { %s1464_s16 = sshll.u32 %s2025_s12, 3  ;;  %s1490_s17 = sshll.u32 %s2025_s12, 4  ;;  %278 = vst.msk [vmem:[#allocation2] sm:$0xff] %vm277_vm1, %v1672_v5  ;;  %279 = vst.msk [vmem:[#allocation2 + $0x8] sm:$0xff] %vm277_vm1, %v1672_v5  ;;  %v1673_v10 = vmov 0   ;;  %v1674_v11 = vmov 0.0  }
   0xe   : > { %s255_s20 = scalar_lea.vmem %s2017_s1, %s1464_s16  ;;  %s247_s23 = scalar_lea.vmem %s2016_s0, %s1490_s17  ;;  %1592 = vset.pattern.permute.xlu1 %v1673_v10  ;;  %280 = vst.msk [vmem:[#allocation3] sm:$0xff] %vm277_vm1, %v1674_v11  ;;  %281 = vst.msk [vmem:[#allocation3 + $0x8] sm:$0xff] %vm277_vm1, %v1674_v11  ;;  %vm421_vm3 = vcmask 7168   ;;  %v1678_v52 = vmov 1   ;;  %vm656_vm4 = vcmask 15368   ;;  %v1679_v62 = vmov 2  }
   0xf   : > { %v289_v0 = vld [vmem:[%s255_s20] sm:$0xff]  ;;  %v286_v2 = vld [vmem:[%s247_s23 + $0x8] sm:$0xff]  ;;  %s262_s28 = scalar_lea.vmem %s2018_s2, %s1464_s16  ;;  %1594 = vset.pattern.permute.xlu0 %v1678_v52  ;;  %vm904_vm5 = vcmask 23568   ;;  %vm1151_vm6 = vcmask 31768   ;;  %vm282_vm7 = vcmask 523264   ;;  %vm768_vm8 = vcmask 261248   ;;  %s271_s8 = scalar_lea.vmem %s2019_s3, %s1490_s17 }
  0x10   : > { %v285_v1 = vld [vmem:[%s247_s23] sm:$0xff]  ;;  %1516 = vmatprep.subr.msk.mxu0 %vm291_vm0, %v289_v0  ;;  %v288_v4 = vmul.f32 0.25, %v286_v2  ;;  %283 = vst.msk [vmem:[#allocation4] sm:$0xff] %vm282_vm7, %v1674_v11  ;;  %284 = vst.msk [vmem:[#allocation4 + $0x8] sm:$0xff] %vm282_vm7, %v1674_v11  ;;  %vm1015_vm9 = vcmask 392448   ;;  %vm1262_vm10 = vcmask 523648  }
  0x11   : > { %v287_v3 = vmul.f32 0.25, %v285_v1  ;;  %1517 = vmatpush3.xpose.msk.msra.mxu0 %vm291_vm0, %v289_v0  ;;  %v1774_v20 = vld [vmem:[%s262_s28] sm:$0xff] }
  0x12   : > { %1521 = vmatprep.subr.mxu1 %v1774_v20 }
  0x13   : > { %1518 = vmatprep.mubr.msk.f32.mxu0 %vm291_vm0, %v287_v3  ;;  %1522 = vmatpush3.msra.mxu1 %v1774_v20 }
  0x14   : > { %1519 = vmatmul.mubr.msk.f32.vlgmr.msra.gmra.mxu0 %vm291_vm0, %v288_v4  ;;  %v1747_v12 = vld [vmem:[#allocation2] sm:$0xff]  ;;  %v1752_v15 = vld [vmem:[#allocation2 + $0x8] sm:$0xff] }
  0xd4   : > { %v1520_v6 = vpop.f32.mrf.mxu0 }
  0xd5   : > { %v382_v9 = vsel %vm378_vm2, %v1520_v6, -inf }
  0xd6   : > { %v367_v7 = vpop.f32.mrf.mxu0 }
  0xd7   : > { %v379_v8 = vsel %vm378_vm2, %v367_v7, -inf }
  0xd8   : > { %380 = vmax.xlane.f32.xlu0 %v379_v8 }
  0xdc   : > { %383 = vmax.xlane.f32.xlu0 %v382_v9 }
  0xf2   : > { %529 = vrot.lane.b32.xlu0 %v289_v0, %s1675_s24 }
  0xf6   : > { %1020 = vrot.lane.b32.xlu0 %v287_v3, %s1676_s25 }
 0x161   : > { %v381_v13 = vpop.xlane.xlu0 %380 }
 0x162   : > { %v1750_v14 = vmax.f32 %v1747_v12, %v381_v13 }
 0x164   : > { %v387_v16 = vsub.f32 %v1747_v12, %v1750_v14  ;;  %523 = vst.msk [vmem:[#allocation2] sm:$0xff] %vm421_vm3, %v1750_v14  ;;  %395 = vperm.xlu1 %1592, %v1750_v14  }
 0x165   : > { %v384_v17 = vpop.xlane.xlu0 %383 }
 0x166   : > { %v1760_v18 = vmax.f32 %v1752_v15, %v384_v17 }
 0x168   : > { %v388_v19 = vsub.f32 %v1752_v15, %v1760_v18  ;;  %524 = vst.msk [vmem:[#allocation2 + $0x8] sm:$0xff] %vm421_vm3, %v1760_v18  ;;  %400 = vperm.xlu1 %1592, %v1760_v18  }
 0x169   : > { %v530_v21 = vpop.permute.xlu0 %529 }
 0x16a   : > { %1526 = vmatprep.subr.msk.mxu1 %vm291_vm0, %v530_v21  ;;  %v391_v12 = vmul.f32 1.442695, %v388_v19 }
 0x16b   : > { %v1838_v56 = vld [vmem:[#allocation2] sm:$0xff] }
 0x16c   : > { %525 = vrot.lane.b32.xlu1 %v287_v3, %s1675_s24 }
 0x16d   : > { %v1021_v36 = vpop.permute.xlu0 %1020  ;;  %1593 = vset.pattern.permute.xlu1 %v1678_v52 }
 0x16f   : > { %v1833_v53 = vld [vmem:[#allocation2 + $0x8] sm:$0xff] }
 0x170   : > { %527 = vrot.lane.b32.xlu1 %v288_v4, %s1675_s24 }
 0x174   : > { %777 = vrot.lane.b32.xlu1 %v289_v0, %s1677_s29 }
 0x178   : > { %773 = vrot.lane.b32.xlu1 %v287_v3, %s1677_s29 }
 0x17c   : > { %775 = vrot.lane.b32.xlu1 %v288_v4, %s1677_s29 }
 0x180   : > { %1024 = vrot.lane.b32.xlu1 %v289_v0, %s1676_s25 }
 0x184   : > { %1022 = vrot.lane.b32.xlu1 %v288_v4, %s1676_s25 }
 0x1df   : > { %v396_v22 = vpop.permute.xlu1 %395 }
 0x1e0   : > { %v403_v23 = vsub.f32 %v367_v7, %v396_v22  ;;  %v1680_v22 = vmov 3  }
 0x1e2   : > { %v405_v24 = vmul.f32 1.442695, %v403_v23 }
 0x1e3   : > { %v401_v25 = vpop.permute.xlu1 %400 }
 0x1e4   : > { %1612 = vpow2.f32 %v405_v24  ;;  %v404_v26 = vsub.f32 %v1520_v6, %v401_v25  ;;  %v389_v25 = vmul.f32 1.442695, %v387_v16 }
 0x1e6   : > { %v407_v27 = vmul.f32 1.442695, %v404_v26 }
 0x1e7   : > { %v526_v28 = vpop.permute.xlu1 %525 }
 0x1e8   : > { %1614 = vpow2.f32 %v407_v27 }
 0x1e9   : > { %1616 = vpow2.f32 %v389_v25  ;;  %v424_v25 = vld [vmem:[#allocation4] sm:$0xff] }
 0x1ea   : > { %1618 = vpow2.f32 %v391_v12 }
 0x1eb   : > { %v528_v29 = vpop.permute.xlu1 %527 }
 0x1ef   : > { %v778_v30 = vpop.permute.xlu1 %777 }
 0x1f1   : > { %v1784_v31 = vpop.eup %1612 }
 0x1f2   : > { %1523 = vmatprep.mubr.msk.f32.mxu1 %vm378_vm2, %v1784_v31  ;;  %v409_v24 = vsel %vm378_vm2, %v1784_v31, 0.0 }
 0x1f3   : > { %v774_v32 = vpop.permute.xlu1 %773 }
 0x1f5   : > { %v1788_v33 = vpop.eup %1614 }
 0x1f6   : > { %1524 = vmatmul.mubr.msk.f32.vlgmr.msra.gmra.mxu1 %vm378_vm2, %v1788_v33  ;;  %v1912_v26 = vpop.eup %1616  ;;  %v412_v14 = vsel %vm378_vm2, %v1788_v33, 0.0 }
 0x1f7   : > { %1527 = vmatpush3.xpose.msk.msra.mxu1 %vm291_vm0, %v530_v21  ;;  %1528 = vmatprep.mubr.msk.f32.mxu1 %vm291_vm0, %v526_v28  ;;  %v776_v34 = vpop.permute.xlu1 %775  ;;  %v1921_v16 = vpop.eup %1618 }
 0x1f8   : > { %1536 = vmatprep.subr.msk.mxu1 %vm291_vm0, %v778_v30 }
 0x1fa   : > { %1529 = vmatmul.mubr.msk.f32.vlgmr.msra.gmra.mxu1 %vm291_vm0, %v528_v29 }
 0x1fb   : > { %1537 = vmatpush3.xpose.msk.msra.mxu1 %vm291_vm0, %v778_v30  ;;  %1538 = vmatprep.mubr.msk.f32.mxu1 %vm291_vm0, %v774_v32  ;;  %v1025_v35 = vpop.permute.xlu1 %1024 }
 0x1fc   : > { %1546 = vmatprep.subr.msk.mxu1 %vm291_vm0, %v1025_v35 }
 0x1fe   : > { %1539 = vmatmul.mubr.msk.f32.vlgmr.msra.gmra.mxu1 %vm291_vm0, %v776_v34 }
 0x1ff   : > { %1547 = vmatpush3.xpose.msk.msra.mxu1 %vm291_vm0, %v1025_v35  ;;  %v1023_v37 = vpop.permute.xlu1 %1022  ;;  %1548 = vmatprep.mubr.msk.f32.mxu1 %vm291_vm0, %v1021_v36 }
 0x202   : > { %1549 = vmatmul.mubr.msk.f32.vlgmr.msra.gmra.mxu1 %vm291_vm0, %v1023_v37 }
 0x2b6   : > { %v1803_v38 = vpop.f32.mrf.mxu1 }
 0x2b8   : > { %v1805_v39 = vpop.f32.mrf.mxu1 }
 0x2ba   : > { %v1807_v40 = vpop.f32.mrf.mxu1 }
 0x2bb   : > { %v617_v41 = vsel %vm378_vm2, %v1807_v40, -inf }
 0x2bc   : > { %618 = vmax.xlane.f32.xlu1 %v617_v41  ;;  %v1811_v42 = vpop.f32.mrf.mxu1 }
 0x2bd   : > { %v614_v43 = vsel %vm378_vm2, %v1811_v42, -inf }
 0x2be   : > { %v1815_v44 = vpop.f32.mrf.mxu1  ;;  %615 = vmax.xlane.f32.xlu0 %v614_v43 }
 0x2bf   : > { %v865_v48 = vsel %vm378_vm2, %v1815_v44, -inf }
 0x2c0   : > { %v1817_v45 = vpop.f32.mrf.mxu1 }
 0x2c1   : > { %v862_v46 = vsel %vm378_vm2, %v1817_v45, -inf }
 0x2c2   : > { %863 = vmax.xlane.f32.xlu0 %v862_v46  ;;  %v1821_v47 = vpop.f32.mrf.mxu1 }
 0x2c3   : > { %v1112_v51 = vsel %vm378_vm2, %v1821_v47, -inf }
 0x2c4   : > { %v1825_v49 = vpop.f32.mrf.mxu1 }
 0x2c5   : > { %v1109_v50 = vsel %vm378_vm2, %v1825_v49, -inf }
 0x2c6   : > { %866 = vmax.xlane.f32.xlu0 %v865_v48  ;;  %1110 = vmax.xlane.f32.xlu1 %v1109_v50 }
 0x2ca   : > { %1113 = vmax.xlane.f32.xlu0 %v1112_v51 }
 0x345   : > { %v619_v54 = vpop.xlane.xlu1 %618 }
 0x346   : > { %v1836_v55 = vmax.f32 %v1833_v53, %v619_v54 }
 0x347   : > { %v616_v57 = vpop.xlane.xlu0 %615 }
 0x348   : > { %v623_v58 = vsub.f32 %v1833_v53, %v1836_v55  ;;  %772 = vst.msk [vmem:[#allocation2 + $0x8] sm:$0xff] %vm656_vm4, %v1836_v55  ;;  %v1845_v59 = vmax.f32 %v1838_v56, %v616_v57  ;;  %635 = vperm.xlu0 %1594, %v1836_v55   ;;  %v416_v55 = vld [vmem:[#allocation3 + $0x8] sm:$0xff] }
 0x34a   : > { %v622_v60 = vsub.f32 %v1838_v56, %v1845_v59  ;;  %771 = vst.msk [vmem:[#allocation2] sm:$0xff] %vm656_vm4, %v1845_v59  ;;  %630 = vperm.xlu1 %1593, %v1845_v59   ;;  %v626_v12 = vmul.f32 1.442695, %v623_v58 }
 0x34b   : > { %v864_v61 = vpop.xlane.xlu0 %863 }
 0x34c   : > { %1597 = vset.pattern.permute.xlu0 %v1673_v10 }
 0x34e   : > { %1595 = vset.pattern.permute.xlu1 %v1679_v62 }
 0x34f   : > { %v1855_v63 = vld [vmem:[#allocation2 + $0x8] sm:$0xff]  ;;  %v867_v0 = vpop.xlane.xlu0 %866  ;;  %v1111_v8 = vpop.xlane.xlu1 %1110 }
 0x350   : > { %v1858_v1 = vmax.f32 %v1855_v63, %v867_v0 }
 0x351   : > { %v1860_v2 = vld [vmem:[#allocation2] sm:$0xff] }
 0x352   : > { %v1863_v3 = vmax.f32 %v1860_v2, %v864_v61  ;;  %v871_v4 = vsub.f32 %v1855_v63, %v1858_v1  ;;  %1019 = vst.msk [vmem:[#allocation2 + $0x8] sm:$0xff] %vm904_vm5, %v1858_v1 }
 0x353   : > { %v1114_v6 = vpop.xlane.xlu0 %1113 }
 0x354   : > { %v870_v5 = vsub.f32 %v1860_v2, %v1863_v3  ;;  %1018 = vst.msk [vmem:[#allocation2] sm:$0xff] %vm904_vm5, %v1863_v3  ;;  %878 = vperm.xlu1 %1595, %v1863_v3   ;;  %v425_v3 = vld [vmem:[#allocation4 + $0x8] sm:$0xff] }
 0x358   : > { %883 = vperm.xlu1 %1595, %v1858_v1  }
 0x359   : > { %v1875_v7 = vld [vmem:[#allocation2 + $0x8] sm:$0xff] }
 0x35a   : > { %v1878_v9 = vmax.f32 %v1875_v7, %v1114_v6 }
 0x35b   : > { %v1880_v13 = vld [vmem:[#allocation2] sm:$0xff] }
 0x35c   : > { %v1118_v17 = vsub.f32 %v1875_v7, %v1878_v9  ;;  %1266 = vst.msk [vmem:[#allocation2 + $0x8] sm:$0xff] %vm1151_vm6, %v1878_v9  ;;  %v1887_v21 = vmax.f32 %v1880_v13, %v1111_v8  ;;  %674 = vrot.lane.b32.xlu1 %v1774_v20, %s1675_s24 }
 0x35d   : > { %1596 = vset.pattern.permute.xlu1 %v1680_v22 }
 0x35e   : > { %v1117_v23 = vsub.f32 %v1880_v13, %v1887_v21  ;;  %1265 = vst.msk [vmem:[#allocation2] sm:$0xff] %vm1151_vm6, %v1887_v21  ;;  %v1121_v13 = vmul.f32 1.442695, %v1118_v17 }
 0x360   : > { %1125 = vperm.xlu1 %1596, %v1887_v21  }
 0x364   : > { %1130 = vperm.xlu1 %1596, %v1878_v9  }
 0x367   : > { %410 = vadd.xlane.f32.xlu0 %v409_v24 }
 0x368   : > { %921 = vrot.lane.b32.xlu1 %v1774_v20, %s1677_s29 }
 0x369   : > { %1598 = vset.pattern.permute.xlu1 %v1673_v10 }
 0x36c   : > { %1168 = vrot.lane.b32.xlu1 %v1774_v20, %s1676_s25 }
 0x37d   : > { %428 = vperm.xlu0 %1597, %v1912_v26  }
 0x381   : > { %1600 = vset.pattern.permute.xlu0 %v1678_v52 }
 0x390   : > { %413 = vadd.xlane.f32.xlu1 %v412_v14 }
 0x3a1   : > { %433 = vperm.xlu1 %1598, %v1921_v16  }
 0x3a5   : > { %1599 = vset.pattern.permute.xlu1 %v1678_v52 }
 0x3c3   : > { %v636_v11 = vpop.permute.xlu0 %635 }
 0x3c4   : > { %v639_v20 = vsub.f32 %v1807_v40, %v636_v11  ;;  %v624_v40 = vmul.f32 1.442695, %v622_v60 }
 0x3c5   : > { %v631_v27 = vpop.permute.xlu1 %630 }
 0x3c6   : > { %v642_v28 = vmul.f32 1.442695, %v639_v20  ;;  %v638_v29 = vsub.f32 %v1811_v42, %v631_v27  ;;  %v872_v20 = vmul.f32 1.442695, %v870_v5 }
 0x3c8   : > { %1620 = vpow2.f32 %v642_v28  ;;  %v640_v15 = vmul.f32 1.442695, %v638_v29 }
 0x3ca   : > { %1622 = vpow2.f32 %v640_v15 }
 0x3cf   : > { %v879_v18 = vpop.permute.xlu1 %878 }
 0x3d0   : > { %v886_v19 = vsub.f32 %v1817_v45, %v879_v18 }
 0x3d2   : > { %v888_v30 = vmul.f32 1.442695, %v886_v19 }
 0x3d3   : > { %v884_v31 = vpop.permute.xlu1 %883 }
 0x3d4   : > { %1624 = vpow2.f32 %v888_v30  ;;  %v887_v32 = vsub.f32 %v1815_v44, %v884_v31 }
 0x3d5   : > { %v1621_v33 = vpop.eup %1620 }
 0x3d6   : > { %v890_v34 = vmul.f32 1.442695, %v887_v32  ;;  %v647_v35 = vsel %vm378_vm2, %v1621_v33, 0.0 }
 0x3d7   : > { %v1623_v36 = vpop.eup %1622  ;;  %v675_v37 = vpop.permute.xlu1 %674  ;;  %648 = vadd.xlane.f32.xlu0 %v647_v35  ;;  %v1119_v35 = vmul.f32 1.442695, %v1117_v23 }
 0x3d8   : > { %1626 = vpow2.f32 %v890_v34  ;;  %1531 = vmatprep.subr.mxu0 %v675_v37  ;;  %1533 = vmatprep.mubr.msk.f32.mxu0 %vm378_vm2, %v1623_v36  ;;  %v644_v41 = vsel %vm378_vm2, %v1623_v36, 0.0 }
 0x3d9   : > { %1532 = vmatpush3.msra.mxu0 %v675_v37  ;;  %645 = vadd.xlane.f32.xlu1 %v644_v41  ;;  %1628 = vpow2.f32 %v624_v40 }
 0x3da   : > { %1534 = vmatmul.mubr.msk.f32.vlgmr.msra.gmra.mxu0 %vm378_vm2, %v1621_v33 }
 0x3db   : > { %v1126_v42 = vpop.permute.xlu1 %1125 }
 0x3dc   : > { %v1133_v43 = vsub.f32 %v1825_v49, %v1126_v42 }
 0x3de   : > { %v1135_v44 = vmul.f32 1.442695, %v1133_v43 }
 0x3df   : > { %v1131_v45 = vpop.permute.xlu1 %1130 }
 0x3e0   : > { %1630 = vpow2.f32 %v1135_v44  ;;  %v1134_v46 = vsub.f32 %v1821_v47, %v1131_v45  ;;  %v415_v47 = vld [vmem:[#allocation3] sm:$0xff] }
 0x3e1   : > { %v1625_v48 = vpop.eup %1624  ;;  %v417_v61 = vmul.f32 %v1912_v26, %v415_v47 }
 0x3e2   : > { %v1137_v50 = vmul.f32 1.442695, %v1134_v46  ;;  %1543 = vmatprep.mubr.msk.f32.mxu0 %vm378_vm2, %v1625_v48  ;;  %v892_v51 = vsel %vm378_vm2, %v1625_v48, 0.0  ;;  %v874_v46 = vmul.f32 1.442695, %v871_v4 }
 0x3e3   : > { %v922_v54 = vpop.permute.xlu1 %921  ;;  %893 = vadd.xlane.f32.xlu0 %v892_v51 }
 0x3e4   : > { %1632 = vpow2.f32 %v1137_v50  ;;  %1541 = vmatprep.subr.mxu0 %v922_v54 }
 0x3e5   : > { %v1627_v56 = vpop.eup %1626  ;;  %1542 = vmatpush3.msra.mxu0 %v922_v54  ;;  %1634 = vpow2.f32 %v626_v12 }
 0x3e6   : > { %1544 = vmatmul.mubr.msk.f32.vlgmr.msra.gmra.mxu0 %vm378_vm2, %v1627_v56  ;;  %v1629_v57 = vpop.eup %1628  ;;  %1636 = vpow2.f32 %v872_v20  ;;  %v895_v53 = vsel %vm378_vm2, %v1627_v56, 0.0 }
 0x3e7   : > { %v1169_v49 = vpop.permute.xlu1 %1168  ;;  %1638 = vpow2.f32 %v1119_v35 }
 0x3e8   : > { %1551 = vmatprep.subr.mxu0 %v1169_v49  ;;  %1640 = vpow2.f32 %v874_v46 }
 0x3e9   : > { %1552 = vmatpush3.msra.mxu0 %v1169_v49  ;;  %1642 = vpow2.f32 %v1121_v13 }
 0x3ea   : > { %663 = vperm.xlu1 %1599, %v1629_v57  }
 0x3ed   : > { %v1631_v59 = vpop.eup %1630 }
 0x3ee   : > { %1553 = vmatprep.mubr.msk.f32.mxu0 %vm378_vm2, %v1631_v59  ;;  %v1139_v60 = vsel %vm378_vm2, %v1631_v59, 0.0  ;;  %1602 = vset.pattern.permute.xlu1 %v1679_v62 }
 0x3ef   : > { %1140 = vadd.xlane.f32.xlu0 %v1139_v60 }
 0x3f0   : > { %v411_v0 = vpop.xlane.xlu0 %410 }
 0x3f1   : > { %v1633_v6 = vpop.eup %1632  ;;  %v419_v8 = vadd.f32 %v417_v61, %v411_v0 }
 0x3f2   : > { %1554 = vmatmul.mubr.msk.f32.vlgmr.msra.gmra.mxu0 %vm378_vm2, %v1633_v6  ;;  %v1142_v24 = vsel %vm378_vm2, %v1633_v6, 0.0  ;;  %v1635_v27 = vpop.eup %1634 }
 0x3f3   : > { %422 = vst.msk [vmem:[#allocation3] sm:$0xff] %vm421_vm3, %v419_v8  ;;  %1143 = vadd.xlane.f32.xlu0 %v1142_v24  ;;  %v1637_v28 = vpop.eup %1636 }
 0x3f4   : > { %v1639_v41 = vpop.eup %1638 }
 0x3f5   : > { %v1641_v48 = vpop.eup %1640 }
 0x3f6   : > { %v1643_v1 = vpop.eup %1642 }
 0x3f8   : > { %v429_v14 = vpop.permute.xlu0 %428 }
 0x3f9   : > { %v436_v11 = vmul.f32 %v429_v14, %v424_v25 }
 0x3fa   : > { %v650_v19 = vld [vmem:[#allocation3] sm:$0xff] }
 0x3fb   : > { %v519_v26 = vadd.f32 %v1805_v39, %v436_v11  ;;  %v418_v39 = vmul.f32 %v1921_v16, %v416_v55  ;;  %v652_v33 = vmul.f32 %v1629_v57, %v650_v19 }
 0x3fd   : > { %521 = vst.msk [vmem:[#allocation4] sm:$0xff] %vm291_vm0, %v519_v26 }
 0x409   : > { %668 = vperm.xlu0 %1600, %v1635_v27  }
 0x40d   : > { %1601 = vset.pattern.permute.xlu0 %v1679_v62 }
 0x40e   : > { %896 = vadd.xlane.f32.xlu1 %v895_v53  ;;  %911 = vperm.xlu0 %1601, %v1637_v28  }
 0x412   : > { %1604 = vset.pattern.permute.xlu0 %v1680_v22 }
 0x419   : > { %v414_v58 = vpop.xlane.xlu1 %413 }
 0x41a   : > { %v420_v2 = vadd.f32 %v418_v39, %v414_v58 }
 0x41c   : > { %423 = vst.msk [vmem:[#allocation3 + $0x8] sm:$0xff] %vm421_vm3, %v420_v2 }
 0x41d   : > { %v434_v5 = vpop.permute.xlu1 %433 }
 0x41e   : > { %v437_v29 = vmul.f32 %v434_v5, %v425_v3 }
 0x420   : > { %v520_v15 = vadd.f32 %v1803_v38, %v437_v29 }
 0x422   : > { %522 = vst.msk [vmem:[#allocation4 + $0x8] sm:$0xff] %vm291_vm0, %v520_v15 }
 0x423   : > { %v651_v18 = vld [vmem:[#allocation3 + $0x8] sm:$0xff] }
 0x424   : > { %v653_v30 = vmul.f32 %v1635_v27, %v651_v18 }
 0x429   : > { %v660_v14 = vld [vmem:[#allocation4 + $0x8] sm:$0xff] }
 0x460   : > { %v649_v31 = vpop.xlane.xlu0 %648 }
 0x461   : > { %v655_v32 = vadd.f32 %v653_v30, %v649_v31 }
 0x462   : > { %v646_v34 = vpop.xlane.xlu1 %645 }
 0x463   : > { %658 = vst.msk [vmem:[#allocation3 + $0x8] sm:$0xff] %vm656_vm4, %v655_v32  ;;  %v654_v16 = vadd.f32 %v652_v33, %v646_v34 }
 0x465   : > { %657 = vst.msk [vmem:[#allocation3] sm:$0xff] %vm656_vm4, %v654_v16 }
 0x466   : > { %v664_v21 = vpop.permute.xlu1 %663 }
 0x46a   : > { %v899_v23 = vld [vmem:[#allocation3 + $0x8] sm:$0xff] }
 0x46b   : > { %v901_v50 = vmul.f32 %v1641_v48, %v899_v23 }
 0x46c   : > { %v898_v38 = vld [vmem:[#allocation3] sm:$0xff]  ;;  %v894_v37 = vpop.xlane.xlu0 %893 }
 0x46d   : > { %v900_v36 = vmul.f32 %v1637_v28, %v898_v38 }
 0x46f   : > { %v902_v40 = vadd.f32 %v900_v36, %v894_v37 }
 0x471   : > { %905 = vst.msk [vmem:[#allocation3] sm:$0xff] %vm904_vm5, %v902_v40 }
 0x478   : > { %v1145_v42 = vld [vmem:[#allocation3] sm:$0xff]  ;;  %v1141_v44 = vpop.xlane.xlu0 %1140 }
 0x479   : > { %v1147_v43 = vmul.f32 %v1639_v41, %v1145_v42 }
 0x47b   : > { %v1149_v45 = vadd.f32 %v1147_v43, %v1141_v44 }
 0x47c   : > { %v1144_v9 = vpop.xlane.xlu0 %1143 }
 0x47d   : > { %1152 = vst.msk [vmem:[#allocation3] sm:$0xff] %vm1151_vm6, %v1149_v45 }
 0x484   : > { %v1270_v63 = vld [vmem:[#allocation3] sm:$0xff]  ;;  %v669_v24 = vpop.permute.xlu0 %668 }
 0x485   : > { %1644 = vrcp.f32 %v1270_v63  ;;  %v672_v11 = vmul.f32 %v669_v24, %v660_v14 }
 0x492   : > { %v1645_v60 = vpop.eup %1644 }
 0x497   : > { %v897_v51 = vpop.xlane.xlu1 %896 }
 0x498   : > { %v903_v54 = vadd.f32 %v901_v50, %v897_v51 }
 0x49a   : > { %906 = vst.msk [vmem:[#allocation3 + $0x8] sm:$0xff] %vm904_vm5, %v903_v54  ;;  %v1535_v56 = vpop.f32.mrf.mxu0 }
 0x49c   : > { %v749_v49 = vpop.f32.mrf.mxu0 }
 0x49d   : > { %760 = vrot.lane.b32.xlu1 %v749_v49, %s1681_s30 }
 0x4a1   : > { %v1146_v4 = vld [vmem:[#allocation3 + $0x8] sm:$0xff]  ;;  %762 = vrot.lane.b32.xlu1 %v1535_v56, %s1681_s30 }
 0x4a2   : > { %v1148_v7 = vmul.f32 %v1643_v1, %v1146_v4 }
 0x4a4   : > { %v1150_v17 = vadd.f32 %v1148_v7, %v1144_v9 }
 0x4a5   : > { %916 = vperm.xlu1 %1602, %v1641_v48  }
 0x4a6   : > { %1153 = vst.msk [vmem:[#allocation3 + $0x8] sm:$0xff] %vm1151_vm6, %v1150_v17  ;;  %v1545_v57 = vpop.f32.mrf.mxu0 }
 0x4a7   : > { %1009 = vrot.lane.b32.xlu0 %v1545_v57, %s1682_s4 }
 0x4a8   : > { %v996_v47 = vpop.f32.mrf.mxu0 }
 0x4a9   : > { %1007 = vrot.lane.b32.xlu1 %v996_v47, %s1682_s4 }
 0x4aa   : > { %1603 = vset.pattern.permute.xlu1 %v1680_v22 }
 0x4ab   : > { %1163 = vperm.xlu0 %1604, %v1643_v1  }
 0x4ad   : > { %v1271_v59 = vld [vmem:[#allocation3 + $0x8] sm:$0xff]  ;;  %1158 = vperm.xlu1 %1603, %v1639_v41  }
 0x4ae   : > { %1646 = vrcp.f32 %v1271_v59 }
 0x4af   : > { %1605 = vset.pattern.permute.xlu0 %v1673_v10 }
 0x4b0   : > { %1278 = vperm.xlu0 %1605, %v1645_v60  }
 0x4b1   : > { %1606 = vset.pattern.permute.xlu1 %v1673_v10  ;;  %v659_v10 = vld [vmem:[#allocation4] sm:$0xff] }
 0x4b2   : > { %v1555_v61 = vpop.f32.mrf.mxu0  ;;  %v671_v8 = vmul.f32 %v664_v21, %v659_v10 }
 0x4b4   : > { %v1243_v0 = vpop.f32.mrf.mxu0  ;;  %1608 = vset.pattern.permute.xlu0 %v1678_v52 }
 0x4b5   : > { %1254 = vrot.lane.b32.xlu1 %v1243_v0, %s1683_s5 }
 0x4b9   : > { %1256 = vrot.lane.b32.xlu1 %v1555_v61, %s1683_s5 }
 0x4bb   : > { %v1647_v6 = vpop.eup %1646 }
 0x4bc   : > { %1297 = vperm.xlu0 %1608, %v1647_v6  }
 0x4bd   : > { %1283 = vperm.xlu1 %1606, %v1647_v6  }
 0x4c0   : > { %1610 = vset.pattern.permute.xlu0 %v1680_v22 }
 0x4c1   : > { %1321 = vperm.xlu0 %1610, %v1645_v60   ;;  %1607 = vset.pattern.permute.xlu1 %v1678_v52 }
 0x4c2   : > { %1293 = vperm.xlu1 %1607, %v1645_v60  }
 0x4c6   : > { %1609 = vset.pattern.permute.xlu1 %v1679_v62  ;;  %v912_v62 = vpop.permute.xlu0 %911 }
 0x4c7   : > { %1307 = vperm.xlu1 %1609, %v1645_v60  }
 0x4cb   : > { %1311 = vperm.xlu1 %1609, %v1647_v6  }
 0x4cf   : > { %1611 = vset.pattern.permute.xlu1 %v1680_v22 }
 0x4d0   : > { %1325 = vperm.xlu1 %1611, %v1647_v6  }
 0x50f   : > { %v761_v25 = vpop.permute.xlu1 %760 }
 0x510   : > { %v766_v12 = vadd.f32 %v761_v25, %v671_v8 }
 0x512   : > { %769 = vst.msk [vmem:[#allocation4] sm:$0xff] %vm768_vm8, %v766_v12 }
 0x513   : > { %v763_v26 = vpop.permute.xlu1 %762 }
 0x514   : > { %v767_v52 = vadd.f32 %v763_v26, %v672_v11 }
 0x516   : > { %770 = vst.msk [vmem:[#allocation4 + $0x8] sm:$0xff] %vm768_vm8, %v767_v52 }
 0x519   : > { %v907_v28 = vld [vmem:[#allocation4] sm:$0xff]  ;;  %v1010_v53 = vpop.permute.xlu0 %1009 }
 0x51a   : > { %v919_v39 = vmul.f32 %v912_v62, %v907_v28 }
 0x51d   : > { %v908_v27 = vld [vmem:[#allocation4 + $0x8] sm:$0xff] }
 0x520   : > { %v917_v20 = vpop.permute.xlu1 %916 }
 0x521   : > { %v920_v22 = vmul.f32 %v917_v20, %v908_v27 }
 0x523   : > { %v1014_v55 = vadd.f32 %v1010_v53, %v920_v22 }
 0x524   : > { %v1008_v58 = vpop.permute.xlu1 %1007 }
 0x525   : > { %1017 = vst.msk [vmem:[#allocation4 + $0x8] sm:$0xff] %vm1015_vm9, %v1014_v55  ;;  %v1013_v2 = vadd.f32 %v1008_v58, %v919_v39 }
 0x526   : > { %v1164_v15 = vpop.permute.xlu0 %1163 }
 0x527   : > { %1016 = vst.msk [vmem:[#allocation4] sm:$0xff] %vm1015_vm9, %v1013_v2 }
 0x528   : > { %v1159_v3 = vpop.permute.xlu1 %1158 }
 0x52b   : > { %v1279_v34 = vpop.permute.xlu0 %1278 }
 0x52c   : > { %v1155_v5 = vld [vmem:[#allocation4 + $0x8] sm:$0xff]  ;;  %v1255_v29 = vpop.permute.xlu1 %1254 }
 0x52d   : > { %v1167_v19 = vmul.f32 %v1164_v15, %v1155_v5 }
 0x52e   : > { %v1154_v18 = vld [vmem:[#allocation4] sm:$0xff] }
 0x52f   : > { %v1166_v30 = vmul.f32 %v1159_v3, %v1154_v18 }
 0x530   : > { %v1257_v31 = vpop.permute.xlu1 %1256 }
 0x531   : > { %v1260_v32 = vadd.f32 %v1255_v29, %v1166_v30  ;;  %v1261_v33 = vadd.f32 %v1257_v31, %v1167_v19 }
 0x533   : > { %1263 = vst.msk [vmem:[#allocation4] sm:$0xff] %vm1262_vm10, %v1260_v32  ;;  %1264 = vst.msk [vmem:[#allocation4 + $0x8] sm:$0xff] %vm1262_vm10, %v1261_v33 }
 0x537   : > { %v1298_v41 = vpop.permute.xlu0 %1297 }
 0x538   : > { %v1284_v16 = vpop.permute.xlu1 %1283 }
 0x53a   : > { %v1275_v35 = vld [vmem:[#allocation4 + $0x8] sm:$0xff]  ;;  %v1274_v38 = vld [vmem:[#allocation4] sm:$0xff] }
 0x53b   : > { %v1287_v36 = vmul.f32 %v1284_v16, %v1275_v35  ;;  %v1286_v37 = vmul.f32 %v1279_v34, %v1274_v38 }
 0x53c   : > { %v1322_v51 = vpop.permute.xlu0 %1321 }
 0x53d   : > { %1289 = vst.msk [vmem:[#allocation4 + $0x8] sm:$0xff] %vm291_vm0, %v1287_v36  ;;  %1288 = vst.msk [vmem:[#allocation4] sm:$0xff] %vm291_vm0, %v1286_v37  ;;  %v1294_v40 = vpop.permute.xlu1 %1293 }
 0x542   : > { %v1308_v46 = vpop.permute.xlu1 %1307 }
 0x544   : > { %v1290_v42 = vld [vmem:[#allocation4] sm:$0xff]  ;;  %v1291_v43 = vld [vmem:[#allocation4 + $0x8] sm:$0xff] }
 0x545   : > { %v1300_v44 = vmul.f32 %v1294_v40, %v1290_v42  ;;  %v1301_v45 = vmul.f32 %v1298_v41, %v1291_v43 }
 0x546   : > { %v1312_v21 = vpop.permute.xlu1 %1311 }
 0x547   : > { %1302 = vst.msk [vmem:[#allocation4] sm:$0xff] %vm768_vm8, %v1300_v44  ;;  %1303 = vst.msk [vmem:[#allocation4 + $0x8] sm:$0xff] %vm768_vm8, %v1301_v45 }
 0x54b   : > { %v1326_v56 = vpop.permute.xlu1 %1325 }
 0x54e   : > { %v1304_v13 = vld [vmem:[#allocation4] sm:$0xff]  ;;  %v1305_v23 = vld [vmem:[#allocation4 + $0x8] sm:$0xff] }
 0x54f   : > { %v1314_v48 = vmul.f32 %v1308_v46, %v1304_v13  ;;  %v1315_v50 = vmul.f32 %v1312_v21, %v1305_v23 }
 0x551   : > { %1316 = vst.msk [vmem:[#allocation4] sm:$0xff] %vm1015_vm9, %v1314_v48  ;;  %1317 = vst.msk [vmem:[#allocation4 + $0x8] sm:$0xff] %vm1015_vm9, %v1315_v50 }
 0x558   : > { %v1318_v54 = vld [vmem:[#allocation4] sm:$0xff]  ;;  %v1319_v49 = vld [vmem:[#allocation4 + $0x8] sm:$0xff] }
 0x559   : > { %v1328_v63 = vmul.f32 %v1322_v51, %v1318_v54  ;;  %v1329_v1 = vmul.f32 %v1326_v56, %v1319_v49 }
 0x55b   : > { %1330 = vst.msk [vmem:[#allocation4] sm:$0xff] %vm1262_vm10, %v1328_v63  ;;  %1331 = vst.msk [vmem:[#allocation4 + $0x8] sm:$0xff] %vm1262_vm10, %v1329_v1 }
 0x562   : > { %v1332_v4 = vld [vmem:[#allocation4] sm:$0xff]  ;;  %v1333_v7 = vld [vmem:[#allocation4 + $0x8] sm:$0xff] }
 0x563   : > { %1335 = vst.msk [vmem:[%s271_s8] sm:$0xff] %vm282_vm7, %v1332_v4  ;;  %1336 = vst.msk [vmem:[%s271_s8 + $0x8] sm:$0xff] %vm282_vm7, %v1333_v7 }
 0x564 PF: > { %s13_s14 = sadd.s32 1, %s1670_s14   ;;  %s2020_s12 = smov %s1666_s13 }
 0x565   : > { %p10_p5 = scmp.ge.s32.totalorder %s13_s14, 4   ;;  %s2021_s13 = smov %s2023_s15 }
 0x567   :  { %12 = sbr.rel (!%p10_p5) target bundleno = 2 (0x2), region = 76 }

</bundles_post_ra>
